<compile_context>
chip_gen: v7x
topology: tpu7x:2x2x1
jax: 0.10.0
libtpu: 0.0.40
codegen_flags: <defaults>
</compile_context>

<pallas_src>
import functools

import jax
import jax.numpy as jnp
from jax.experimental import pallas as pl
from jax.experimental.pallas import tpu as pltpu

BN_EPS = 1e-5
LANE = 128
VMEM_LIMIT_A = 48 * 1024 * 1024
VMEM_LIMIT_B = 32 * 1024 * 1024


def _round_up(x, m):
    return (x + m - 1) // m * m


def _pick_tm(R, Kp, Cout):
    """Largest power-of-two row tile whose kernel-A working set fits the budget."""
    budget = 24 * 1024 * 1024
    r8 = _round_up(R, 8)
    tm = 1024
    while tm > 8:
        est = (2 * tm * Kp * 2        # double-buffered bf16 patch tile
               + 2 * Kp * Cout * 2    # resident bf16 weight block (counted 2x)
               + 2 * tm * Cout * 2    # double-buffered bf16 y output tile
               + 2 * 8 * Cout * 4     # stats output tile
               + tm * Cout * 4)       # f32 dot result temp
        if est <= budget and tm <= r8:
            break
        tm //= 2
    tm = max(tm, 8)
    # Keep >=2 row blocks when possible so megacore (v7x) has work to shard.
    if _round_up(R, tm) // tm < 2 and tm >= 256:
        tm //= 2
    return tm


def _pick_tm_b(Rp, tm):
    """Grow kernel B's row tile (pure memory-bound) while keeping >=2 blocks."""
    tm_b = tm
    while tm_b < 1024 and Rp % (tm_b * 2) == 0 and Rp // (tm_b * 2) >= 2:
        tm_b *= 2
    return tm_b


# --------------------- kernel A: conv matmul + BN stats -----------------------
def _conv_stats_kernel(x_ref, w_ref, y_ref, stats_ref):
    # bf16 x bf16 -> f32 on the MXU; weights are the full-K resident block.
    y = jnp.dot(x_ref[...], w_ref[...], preferred_element_type=jnp.float32)
    y_ref[...] = y.astype(y_ref.dtype)
    # Per-channel partial sums for training-mode BN (rows 2..7 never read).
    stats_ref[0:1, :] = jnp.sum(y, axis=0, keepdims=True)
    stats_ref[1:2, :] = jnp.sum(y * y, axis=0, keepdims=True)


def _conv_stats(patches_bf16, w_bf16, *, tm):
    """patches: (Rp, Kp) bf16, w: (Kp, Cout) bf16 ->
       (y (Rp, Cout) bf16, stats (8*mt, Cout) f32)."""
    Rp, Kp = patches_bf16.shape
    Cout = w_bf16.shape[1]
    mt = Rp // tm

    return pl.pallas_call(
        _conv_stats_kernel,
        grid=(mt,),
        in_specs=[
            pl.BlockSpec((tm, Kp), lambda m: (m, 0)),
            pl.BlockSpec((Kp, Cout), lambda m: (0, 0)),   # resident, fetched once
        ],
        out_specs=[
            pl.BlockSpec((tm, Cout), lambda m: (m, 0)),
            pl.BlockSpec((8, Cout), lambda m: (m, 0)),
        ],
        out_shape=[
            jax.ShapeDtypeStruct((Rp, Cout), jnp.bfloat16),
            jax.ShapeDtypeStruct((8 * mt, Cout), jnp.float32),
        ],
        compiler_params=pltpu.CompilerParams(
            dimension_semantics=("parallel",),
            vmem_limit_bytes=VMEM_LIMIT_A,
        ),
    )(patches_bf16, w_bf16)


# ------------------ kernel B: BN epilogue (+residual, +ReLU) ------------------
def _bn_act_kernel(*refs, apply_relu, add_residual):
    if add_residual:
        y_ref, ss_ref, r_ref, rss_ref, o_ref = refs
    else:
        y_ref, ss_ref, o_ref = refs

    y = y_ref[...].astype(jnp.float32) * ss_ref[0:1, :] + ss_ref[1:2, :]
    if add_residual:
        y = y + (r_ref[...].astype(jnp.float32) * rss_ref[0:1, :] + rss_ref[1:2, :])
    if apply_relu:
        y = jnp.maximum(y, 0.0)
    o_ref[...] = y.astype(o_ref.dtype)


def _bn_act(y, scale_shift, *, cp, y_col, residual=None, residual_col=0,
            residual_scale_shift=None, apply_relu=True, out_dtype, tm):
    """y (and residual) may be wider than cp; y_col / residual_col pick the
    lane block of width cp to read (avoids HBM slicing copies)."""
    Rp = y.shape[0]
    mt = Rp // tm
    add_residual = residual is not None

    kernel = functools.partial(_bn_act_kernel, apply_relu=apply_relu,
                               add_residual=add_residual)
    in_arrays = [y, scale_shift]
    in_specs = [
        pl.BlockSpec((tm, cp), lambda m: (m, y_col)),
        pl.BlockSpec((2, cp), lambda m: (0, 0)),   # constant index -> fetched once
    ]
    if add_residual:
        in_arrays += [residual, residual_scale_shift]
        in_specs += [
            pl.BlockSpec((tm, cp), lambda m: (m, residual_col)),
            pl.BlockSpec((2, cp), lambda m: (0, 0)),
        ]

    return pl.pallas_call(
        kernel,
        grid=(mt,),
        in_specs=in_specs,
        out_specs=pl.BlockSpec((tm, cp), lambda m: (m, 0)),
        out_shape=jax.ShapeDtypeStruct((Rp, cp), out_dtype),
        compiler_params=pltpu.CompilerParams(
            dimension_semantics=("parallel",),
            vmem_limit_bytes=VMEM_LIMIT_B,
        ),
    )(*in_arrays)


# --------------------------------- JAX glue -----------------------------------
def _im2col(x_nhwc, ksize, stride, pad):
    """(N,H,W,C) -> (N*Ho*Wo, ksize*ksize*C), rows ordered (n, ho, wo)."""
    N, H, W, C = x_nhwc.shape
    xp = jnp.pad(x_nhwc, ((0, 0), (pad, pad), (pad, pad), (0, 0)))
    Ho = (H + 2 * pad - ksize) // stride + 1
    Wo = (W + 2 * pad - ksize) // stride + 1
    cols = []
    for kh in range(ksize):
        for kw in range(ksize):
            cols.append(
                xp[:, kh: kh + stride * Ho: stride, kw: kw + stride * Wo: stride, :]
            )
    patches = jnp.concatenate(cols, axis=-1)
    return patches.reshape(N * Ho * Wo, ksize * ksize * C)


def _weight_to_matmul(w_oihw):
    """PyTorch (Cout, Cin, KH, KW) -> (KH*KW*Cin, Cout), matching im2col order."""
    cout, cin, kh, kw = w_oihw.shape
    return jnp.transpose(w_oihw, (2, 3, 1, 0)).reshape(kh * kw * cin, cout)


def _pad2d(a, rows, cols):
    r, c = a.shape
    return jnp.pad(a, ((0, rows - r), (0, cols - c)))


def _bn_scale_shift(stats, gamma, beta, rows, cp):
    """Finalise per-channel BN: stats (8*mt, cp) -> stacked (2, cp) scale/shift."""
    mt = stats.shape[0] // 8
    st = stats.reshape(mt, 8, cp)
    s1 = jnp.sum(st[:, 0, :], axis=0)
    s2 = jnp.sum(st[:, 1, :], axis=0)
    mean = s1 / rows
    var = jnp.maximum(s2 / rows - mean * mean, 0.0)
    inv = jax.lax.rsqrt(var + BN_EPS)
    g = jnp.zeros((cp,), jnp.float32).at[: gamma.shape[0]].set(gamma)
    b = jnp.zeros((cp,), jnp.float32).at[: beta.shape[0]].set(beta)
    scale = g * inv
    shift = b - mean * scale
    return jnp.stack([scale, shift], axis=0)


@functools.partial(jax.jit, static_argnums=2)
def basic_block_forward(x_nchw, params, stride):
    """Pallas implementation of BasicBlock.forward (training-mode BN).  NCHW in/out."""
    x = jnp.transpose(x_nchw, (0, 2, 3, 1)).astype(jnp.float32)   # NHWC
    xb = x.astype(jnp.bfloat16)
    N, H, W, Cin = x.shape
    planes = params["w1"].shape[0]
    has_ds = (stride != 1) or (Cin != planes)

    Ho = (H + 2 - 3) // stride + 1
    Wo = (W + 2 - 3) // stride + 1
    R = N * Ho * Wo
    Cp = _round_up(planes, LANE)
    Kp1 = _round_up(9 * Cin, LANE)
    Kp2 = _round_up(9 * planes, LANE)
    Cout1 = 2 * Cp if has_ds else Cp

    tm = _pick_tm(R, max(Kp1, Kp2), max(Cout1, Cp))
    Rp = _round_up(R, tm)
    tm_b = _pick_tm_b(Rp, tm)

    # ---- conv1 (3x3/s, pad=1) [+ fused 1x1/s downsample] : one MXU pass ----
    p1 = _pad2d(_im2col(xb, 3, stride, 1), Rp, Kp1)
    w1m = _weight_to_matmul(params["w1"])                      # (9*Cin, planes)
    if has_ds:
        # The 1x1 stride-s conv reads exactly the centre tap (kh=1,kw=1) of the
        # 3x3 patch, so wd embeds at rows [4*Cin, 5*Cin) of a second Cout block.
        wdm = _weight_to_matmul(params["wd"])                  # (Cin, planes)
        wd_embed = jnp.zeros((9 * Cin, planes), jnp.float32)
        wd_embed = wd_embed.at[4 * Cin:5 * Cin, :].set(wdm)
        w1c = jnp.concatenate(
            [_pad2d(w1m, Kp1, Cp), _pad2d(wd_embed, Kp1, Cp)], axis=1)
    else:
        w1c = _pad2d(w1m, Kp1, Cp)
    y1, st1 = _conv_stats(p1, w1c.astype(jnp.bfloat16), tm=tm)

    ss1 = _bn_scale_shift(st1[:, :Cp], params["g1"], params["b1"], R, Cp)
    # bn1 + relu (bf16 output: only consumed by conv2's bf16 matmul)
    out1 = _bn_act(y1, ss1, cp=Cp, y_col=0, apply_relu=True,
                   out_dtype=jnp.bfloat16, tm=tm_b)

    # ---- residual path (downsample pre-BN output lives in y1's 2nd block) ----
    if has_ds:
        res, res_col = y1, 1
        res_ss = _bn_scale_shift(st1[:, Cp:], params["gd"], params["bd"], R, Cp)
    else:
        res = _pad2d(xb.reshape(N * H * W, Cin), Rp, Cp)       # bf16 identity
        res_col = 0
        res_ss = jnp.stack([jnp.ones((Cp,), jnp.float32),
                            jnp.zeros((Cp,), jnp.float32)], axis=0)

    # ---- conv2 (3x3/1, pad=1) + bn2 + residual(+BN) + relu ----
    out1_img = out1[:R].reshape(N, Ho, Wo, Cp)[:, :, :, :planes]
    p2 = _pad2d(_im2col(out1_img, 3, 1, 1), Rp, Kp2)
    w2 = _pad2d(_weight_to_matmul(params["w2"]), Kp2, Cp).astype(jnp.bfloat16)
    y2, st2 = _conv_stats(p2, w2, tm=tm)
    ss2 = _bn_scale_shift(st2, params["g2"], params["b2"], R, Cp)
    out = _bn_act(y2, ss2, cp=Cp, y_col=0, residual=res, residual_col=res_col,
                  residual_scale_shift=res_ss, apply_relu=True,
                  out_dtype=jnp.float32, tm=tm_b)

    out = out[:R].reshape(N, Ho, Wo, Cp)[:, :, :, :planes]
    return jnp.transpose(out, (0, 3, 1, 2))                    # NCHW


# ----------------------------- pure-JAX reference -----------------------------
def _ref_forward(x_nchw, params, stride, matmul_dtype=jnp.float32):
    prec = jax.lax.Precision.HIGHEST if matmul_dtype == jnp.float32 else None

    def conv(x, w, s, pad):
        return jax.lax.conv_general_dilated(
            x.astype(matmul_dtype), w.astype(matmul_dtype), (s, s),
            [(pad, pad), (pad, pad)],
            dimension_numbers=("NCHW", "OIHW", "NCHW"),
            preferred_element_type=jnp.float32, precision=prec)

    def bn(x, g, b):
        mean = jnp.mean(x, axis=(0, 2, 3), keepdims=True)
        var = jnp.mean(jnp.square(x - mean), axis=(0, 2, 3), keepdims=True)
        xn = (x - mean) * jax.lax.rsqrt(var + BN_EPS)
        return xn * g.reshape(1, -1, 1, 1) + b.reshape(1, -1, 1, 1)

    x = x_nchw.astype(jnp.float32)
    out = jax.nn.relu(bn(conv(x, params["w1"], stride, 1), params["g1"], params["b1"]))
    out = bn(conv(out, params["w2"], 1, 1), params["g2"], params["b2"])
    if stride != 1 or x.shape[1] != params["w1"].shape[0]:
        identity = bn(conv(x, params["wd"], stride, 0), params["gd"], params["bd"])
    else:
        identity = x
    return jax.nn.relu(out + identity)


# ----------------------------------- main --------------------------------------
def _make_params(key, in_planes, planes):
    ks = jax.random.split(key, 9)
    return {
        "w1": 0.1 * jax.random.normal(ks[0], (planes, in_planes, 3, 3), jnp.float32),
        "g1": 1.0 + 0.1 * jax.random.normal(ks[1], (planes,), jnp.float32),
        "b1": 0.1 * jax.random.normal(ks[2], (planes,), jnp.float32),
        "w2": 0.1 * jax.random.normal(ks[3], (planes, planes, 3, 3), jnp.float32),
        "g2": 1.0 + 0.1 * jax.random.normal(ks[4], (planes,), jnp.float32),
        "b2": 0.1 * jax.random.normal(ks[5], (planes,), jnp.float32),
        "wd": 0.1 * jax.random.normal(ks[6], (planes, in_planes, 1, 1), jnp.float32),
        "gd": 1.0 + 0.1 * jax.random.normal(ks[7], (planes,), jnp.float32),
        "bd": 0.1 * jax.random.normal(ks[8], (planes,), jnp.float32),
    }


def _check(x, params, stride):
    out = jax.block_until_ready(basic_block_forward(x, params, stride))
    N, _, H, W = x.shape
    planes = params["w1"].shape[0]
    assert out.shape == (N, planes, H // stride, W // stride), out.shape

    # Structural check vs a reference run at bf16 MXU input precision.
    # Tolerances account for the intentional bf16 storage of the pre-BN conv
    # outputs and of the residual (f32 accumulation everywhere).
    ref_b = _ref_forward(x, params, stride, jnp.bfloat16)
    err_b = float(jnp.max(jnp.abs(out - ref_b)))
    assert jnp.allclose(out, ref_b, atol=2e-2, rtol=2e-2), err_b

    # Accuracy check vs the full-f32 (PyTorch-equivalent) reference.
    ref_f = _ref_forward(x, params, stride, jnp.float32)
    err_f = float(jnp.max(jnp.abs(out - ref_f)))
    assert jnp.allclose(out, ref_f, atol=5e-2, rtol=5e-2), err_f


if __name__ == "__main__":
    key = jax.random.PRNGKey(0)
    k1, k2, k3, k4 = jax.random.split(key, 4)

    # Case 1: stride=2, channel change -> downsample fused into conv1's matmul.
    x1 = jax.random.normal(k1, (2, 4, 16, 16), dtype=jnp.float32)
    _check(x1, _make_params(k2, 4, 8), stride=2)

    # Case 2: stride=1, same channels -> plain identity residual path.
    x2 = jax.random.normal(k3, (2, 8, 16, 16), dtype=jnp.float32)
    _check(x2, _make_params(k4, 8, 8), stride=1)

    print("KERNEL_OK")
</pallas_src>

<mosaic_0001>
module attributes {stable_mosaic.version = 11 : i64} {
  func.func @_conv_stats_kernel(%arg0: i32, %arg1: memref<128x128xbf16, #tpu.memory_space<vmem>>, %arg2: memref<128x256xbf16, #tpu.memory_space<vmem>>, %arg3: memref<128x256xbf16, #tpu.memory_space<vmem>>, %arg4: memref<8x256xf32, #tpu.memory_space<vmem>>) attributes {dimension_semantics = [#tpu.dimension_semantics<parallel>], iteration_bounds = array<i64: 1>, scalar_prefetch = 0 : i64, scratch_operands = 0 : i64, tpu.core_type = #tpu.core_type<tc>, window_params = [{transform_indices = @transform_0, window_bounds = array<i64: 128, 128>}, {pipeline_mode = #tpu.pipeline_mode<synchronous>, transform_indices = @transform_1, window_bounds = array<i64: 128, 256>}, {transform_indices = @transform_2, window_bounds = array<i64: 128, 256>}, {transform_indices = @transform_3, window_bounds = array<i64: 8, 256>}]} {
    %c0 = arith.constant 0 : index
    %c0_0 = arith.constant 0 : index
    %0 = vector.load %arg1[%c0, %c0_0] : memref<128x128xbf16, #tpu.memory_space<vmem>>, vector<128x128xbf16>
    %c0_1 = arith.constant 0 : index
    %c0_2 = arith.constant 0 : index
    %1 = vector.load %arg2[%c0_1, %c0_2] : memref<128x256xbf16, #tpu.memory_space<vmem>>, vector<128x256xbf16>
    %cst = arith.constant dense<0.000000e+00> : vector<128x256xf32>
    %2 = tpu.matmul %0, %1, %cst {dimension_numbers = #tpu.dot_dimension_numbers<[1], [0], [0], [1], [0, 0, 1, 1], [], []>} : vector<128x128xbf16>, vector<128x256xbf16>, vector<128x256xf32> -> vector<128x256xf32>
    %3 = arith.truncf %2 : vector<128x256xf32> to vector<128x256xbf16>
    %c0_3 = arith.constant 0 : index
    %c0_4 = arith.constant 0 : index
    %4 = vector.load %arg3[%c0_3, %c0_4] : memref<128x256xbf16, #tpu.memory_space<vmem>>, vector<128x256xbf16>
    tpu.vector_store %arg3[%c0_3, %c0_4], %3 {strides = array<i32>} : memref<128x256xbf16, #tpu.memory_space<vmem>>, vector<128x256xbf16>,
    %cst_5 = arith.constant dense<0.000000e+00> : vector<256xf32>
    %5 = vector.multi_reduction <add>, %2, %cst_5 [0] : vector<128x256xf32> to vector<256xf32>
    %6 = vector.shape_cast %5 : vector<256xf32> to vector<1x256xf32>
    %c0_6 = arith.constant 0 : index
    %c0_7 = arith.constant 0 : index
    %7 = vector.load %arg4[%c0_6, %c0_7] : memref<8x256xf32, #tpu.memory_space<vmem>>, vector<1x256xf32>
    tpu.vector_store %arg4[%c0_6, %c0_7], %6 {strides = array<i32>} : memref<8x256xf32, #tpu.memory_space<vmem>>, vector<1x256xf32>,
    %8 = arith.mulf %2, %2 : vector<128x256xf32>
    %cst_8 = arith.constant dense<0.000000e+00> : vector<256xf32>
    %9 = vector.multi_reduction <add>, %8, %cst_8 [0] : vector<128x256xf32> to vector<256xf32>
    %10 = vector.shape_cast %9 : vector<256xf32> to vector<1x256xf32>
    %c1 = arith.constant 1 : index
    %c0_9 = arith.constant 0 : index
    %11 = vector.load %arg4[%c1, %c0_9] : memref<8x256xf32, #tpu.memory_space<vmem>>, vector<1x256xf32>
    tpu.vector_store %arg4[%c1, %c0_9], %10 {strides = array<i32>} : memref<8x256xf32, #tpu.memory_space<vmem>>, vector<1x256xf32>,
    return
  }
  func.func @transform_0(%arg0: i32) -> (i32, i32) {
    %c0_i32 = arith.constant 0 : i32
    %c0_i32_0 = arith.constant 0 : i32
    return %arg0, %c0_i32 : i32, i32
  }
  func.func @transform_1(%arg0: i32) -> (i32, i32) {
    %c0_i32 = arith.constant 0 : i32
    %c0_i32_0 = arith.constant 0 : i32
    %c0_i32_1 = arith.constant 0 : i32
    return %c0_i32, %c0_i32_0 : i32, i32
  }
  func.func @transform_2(%arg0: i32) -> (i32, i32) {
    %c0_i32 = arith.constant 0 : i32
    %c0_i32_0 = arith.constant 0 : i32
    return %arg0, %c0_i32 : i32, i32
  }
  func.func @transform_3(%arg0: i32) -> (i32, i32) {
    %c0_i32 = arith.constant 0 : i32
    %c0_i32_0 = arith.constant 0 : i32
    return %arg0, %c0_i32 : i32, i32
  }
}

module attributes {stable_mosaic.version = 11 : i64} {
  func.func @_bn_act_kernel(%arg0: i32, %arg1: memref<128x128xbf16, #tpu.memory_space<vmem>>, %arg2: memref<2x128xf32, #tpu.memory_space<vmem>>, %arg3: memref<128x128xbf16, #tpu.memory_space<vmem>>) attributes {dimension_semantics = [#tpu.dimension_semantics<parallel>], iteration_bounds = array<i64: 1>, scalar_prefetch = 0 : i64, scratch_operands = 0 : i64, tpu.core_type = #tpu.core_type<tc>, window_params = [{transform_indices = @transform_0, window_bounds = array<i64: 128, 128>}, {pipeline_mode = #tpu.pipeline_mode<synchronous>, transform_indices = @transform_1, window_bounds = array<i64: 2, 128>}, {transform_indices = @transform_2, window_bounds = array<i64: 128, 128>}]} {
    %c0 = arith.constant 0 : index
    %c0_0 = arith.constant 0 : index
    %0 = vector.load %arg1[%c0, %c0_0] : memref<128x128xbf16, #tpu.memory_space<vmem>>, vector<128x128xbf16>
    %1 = arith.extf %0 : vector<128x128xbf16> to vector<128x128xf32>
    %c0_1 = arith.constant 0 : index
    %c0_2 = arith.constant 0 : index
    %2 = vector.load %arg2[%c0_1, %c0_2] : memref<2x128xf32, #tpu.memory_space<vmem>>, vector<1x128xf32>
    %3 = vector.broadcast %2 : vector<1x128xf32> to vector<128x128xf32>
    %4 = arith.mulf %1, %3 : vector<128x128xf32>
    %c1 = arith.constant 1 : index
    %c0_3 = arith.constant 0 : index
    %5 = vector.load %arg2[%c1, %c0_3] : memref<2x128xf32, #tpu.memory_space<vmem>>, vector<1x128xf32>
    %6 = vector.broadcast %5 : vector<1x128xf32> to vector<128x128xf32>
    %7 = arith.addf %4, %6 : vector<128x128xf32>
    %cst = arith.constant 0.000000e+00 : f32
    %8 = vector.broadcast %cst : f32 to vector<128x128xf32>
    %9 = arith.maximumf %7, %8 : vector<128x128xf32>
    %10 = arith.truncf %9 : vector<128x128xf32> to vector<128x128xbf16>
    %c0_4 = arith.constant 0 : index
    %c0_5 = arith.constant 0 : index
    %11 = vector.load %arg3[%c0_4, %c0_5] : memref<128x128xbf16, #tpu.memory_space<vmem>>, vector<128x128xbf16>
    tpu.vector_store %arg3[%c0_4, %c0_5], %10 {strides = array<i32>} : memref<128x128xbf16, #tpu.memory_space<vmem>>, vector<128x128xbf16>,
    return
  }
  func.func @transform_0(%arg0: i32) -> (i32, i32) {
    %c0_i32 = arith.constant 0 : i32
    %c0_i32_0 = arith.constant 0 : i32
    return %arg0, %c0_i32 : i32, i32
  }
  func.func @transform_1(%arg0: i32) -> (i32, i32) {
    %c0_i32 = arith.constant 0 : i32
    %c0_i32_0 = arith.constant 0 : i32
    %c0_i32_1 = arith.constant 0 : i32
    return %c0_i32, %c0_i32_0 : i32, i32
  }
  func.func @transform_2(%arg0: i32) -> (i32, i32) {
    %c0_i32 = arith.constant 0 : i32
    %c0_i32_0 = arith.constant 0 : i32
    return %arg0, %c0_i32 : i32, i32
  }
}

module attributes {stable_mosaic.version = 11 : i64} {
  func.func @_conv_stats_kernel(%arg0: i32, %arg1: memref<128x128xbf16, #tpu.memory_space<vmem>>, %arg2: memref<128x128xbf16, #tpu.memory_space<vmem>>, %arg3: memref<128x128xbf16, #tpu.memory_space<vmem>>, %arg4: memref<8x128xf32, #tpu.memory_space<vmem>>) attributes {dimension_semantics = [#tpu.dimension_semantics<parallel>], iteration_bounds = array<i64: 1>, scalar_prefetch = 0 : i64, scratch_operands = 0 : i64, tpu.core_type = #tpu.core_type<tc>, window_params = [{transform_indices = @transform_0, window_bounds = array<i64: 128, 128>}, {pipeline_mode = #tpu.pipeline_mode<synchronous>, transform_indices = @transform_1, window_bounds = array<i64: 128, 128>}, {transform_indices = @transform_2, window_bounds = array<i64: 128, 128>}, {transform_indices = @transform_3, window_bounds = array<i64: 8, 128>}]} {
    %c0 = arith.constant 0 : index
    %c0_0 = arith.constant 0 : index
    %0 = vector.load %arg1[%c0, %c0_0] : memref<128x128xbf16, #tpu.memory_space<vmem>>, vector<128x128xbf16>
    %c0_1 = arith.constant 0 : index
    %c0_2 = arith.constant 0 : index
    %1 = vector.load %arg2[%c0_1, %c0_2] : memref<128x128xbf16, #tpu.memory_space<vmem>>, vector<128x128xbf16>
    %cst = arith.constant dense<0.000000e+00> : vector<128x128xf32>
    %2 = tpu.matmul %0, %1, %cst {dimension_numbers = #tpu.dot_dimension_numbers<[1], [0], [0], [1], [0, 0, 1, 1], [], []>} : vector<128x128xbf16>, vector<128x128xbf16>, vector<128x128xf32> -> vector<128x128xf32>
    %3 = arith.truncf %2 : vector<128x128xf32> to vector<128x128xbf16>
    %c0_3 = arith.constant 0 : index
    %c0_4 = arith.constant 0 : index
    %4 = vector.load %arg3[%c0_3, %c0_4] : memref<128x128xbf16, #tpu.memory_space<vmem>>, vector<128x128xbf16>
    tpu.vector_store %arg3[%c0_3, %c0_4], %3 {strides = array<i32>} : memref<128x128xbf16, #tpu.memory_space<vmem>>, vector<128x128xbf16>,
    %cst_5 = arith.constant dense<0.000000e+00> : vector<128xf32>
    %5 = vector.multi_reduction <add>, %2, %cst_5 [0] : vector<128x128xf32> to vector<128xf32>
    %6 = vector.shape_cast %5 : vector<128xf32> to vector<1x128xf32>
    %c0_6 = arith.constant 0 : index
    %c0_7 = arith.constant 0 : index
    %7 = vector.load %arg4[%c0_6, %c0_7] : memref<8x128xf32, #tpu.memory_space<vmem>>, vector<1x128xf32>
    tpu.vector_store %arg4[%c0_6, %c0_7], %6 {strides = array<i32>} : memref<8x128xf32, #tpu.memory_space<vmem>>, vector<1x128xf32>,
    %8 = arith.mulf %2, %2 : vector<128x128xf32>
    %cst_8 = arith.constant dense<0.000000e+00> : vector<128xf32>
    %9 = vector.multi_reduction <add>, %8, %cst_8 [0] : vector<128x128xf32> to vector<128xf32>
    %10 = vector.shape_cast %9 : vector<128xf32> to vector<1x128xf32>
    %c1 = arith.constant 1 : index
    %c0_9 = arith.constant 0 : index
    %11 = vector.load %arg4[%c1, %c0_9] : memref<8x128xf32, #tpu.memory_space<vmem>>, vector<1x128xf32>
    tpu.vector_store %arg4[%c1, %c0_9], %10 {strides = array<i32>} : memref<8x128xf32, #tpu.memory_space<vmem>>, vector<1x128xf32>,
    return
  }
  func.func @transform_0(%arg0: i32) -> (i32, i32) {
    %c0_i32 = arith.constant 0 : i32
    %c0_i32_0 = arith.constant 0 : i32
    return %arg0, %c0_i32 : i32, i32
  }
  func.func @transform_1(%arg0: i32) -> (i32, i32) {
    %c0_i32 = arith.constant 0 : i32
    %c0_i32_0 = arith.constant 0 : i32
    %c0_i32_1 = arith.constant 0 : i32
    return %c0_i32, %c0_i32_0 : i32, i32
  }
  func.func @transform_2(%arg0: i32) -> (i32, i32) {
    %c0_i32 = arith.constant 0 : i32
    %c0_i32_0 = arith.constant 0 : i32
    return %arg0, %c0_i32 : i32, i32
  }
  func.func @transform_3(%arg0: i32) -> (i32, i32) {
    %c0_i32 = arith.constant 0 : i32
    %c0_i32_0 = arith.constant 0 : i32
    return %arg0, %c0_i32 : i32, i32
  }
}

module attributes {stable_mosaic.version = 11 : i64} {
  func.func @_bn_act_kernel(%arg0: i32, %arg1: memref<128x128xbf16, #tpu.memory_space<vmem>>, %arg2: memref<2x128xf32, #tpu.memory_space<vmem>>, %arg3: memref<128x128xbf16, #tpu.memory_space<vmem>>, %arg4: memref<2x128xf32, #tpu.memory_space<vmem>>, %arg5: memref<128x128xf32, #tpu.memory_space<vmem>>) attributes {dimension_semantics = [#tpu.dimension_semantics<parallel>], iteration_bounds = array<i64: 1>, scalar_prefetch = 0 : i64, scratch_operands = 0 : i64, tpu.core_type = #tpu.core_type<tc>, window_params = [{transform_indices = @transform_0, window_bounds = array<i64: 128, 128>}, {pipeline_mode = #tpu.pipeline_mode<synchronous>, transform_indices = @transform_1, window_bounds = array<i64: 2, 128>}, {transform_indices = @transform_2, window_bounds = array<i64: 128, 128>}, {pipeline_mode = #tpu.pipeline_mode<synchronous>, transform_indices = @transform_3, window_bounds = array<i64: 2, 128>}, {transform_indices = @transform_4, window_bounds = array<i64: 128, 128>}]} {
    %c0 = arith.constant 0 : index
    %c0_0 = arith.constant 0 : index
    %0 = vector.load %arg1[%c0, %c0_0] : memref<128x128xbf16, #tpu.memory_space<vmem>>, vector<128x128xbf16>
    %1 = arith.extf %0 : vector<128x128xbf16> to vector<128x128xf32>
    %c0_1 = arith.constant 0 : index
    %c0_2 = arith.constant 0 : index
    %2 = vector.load %arg2[%c0_1, %c0_2] : memref<2x128xf32, #tpu.memory_space<vmem>>, vector<1x128xf32>
    %3 = vector.broadcast %2 : vector<1x128xf32> to vector<128x128xf32>
    %4 = arith.mulf %1, %3 : vector<128x128xf32>
    %c1 = arith.constant 1 : index
    %c0_3 = arith.constant 0 : index
    %5 = vector.load %arg2[%c1, %c0_3] : memref<2x128xf32, #tpu.memory_space<vmem>>, vector<1x128xf32>
    %6 = vector.broadcast %5 : vector<1x128xf32> to vector<128x128xf32>
    %7 = arith.addf %4, %6 : vector<128x128xf32>
    %c0_4 = arith.constant 0 : index
    %c0_5 = arith.constant 0 : index
    %8 = vector.load %arg3[%c0_4, %c0_5] : memref<128x128xbf16, #tpu.memory_space<vmem>>, vector<128x128xbf16>
    %9 = arith.extf %8 : vector<128x128xbf16> to vector<128x128xf32>
    %c0_6 = arith.constant 0 : index
    %c0_7 = arith.constant 0 : index
    %10 = vector.load %arg4[%c0_6, %c0_7] : memref<2x128xf32, #tpu.memory_space<vmem>>, vector<1x128xf32>
    %11 = vector.broadcast %10 : vector<1x128xf32> to vector<128x128xf32>
    %12 = arith.mulf %9, %11 : vector<128x128xf32>
    %c1_8 = arith.constant 1 : index
    %c0_9 = arith.constant 0 : index
    %13 = vector.load %arg4[%c1_8, %c0_9] : memref<2x128xf32, #tpu.memory_space<vmem>>, vector<1x128xf32>
    %14 = vector.broadcast %13 : vector<1x128xf32> to vector<128x128xf32>
    %15 = arith.addf %12, %14 : vector<128x128xf32>
    %16 = arith.addf %7, %15 : vector<128x128xf32>
    %cst = arith.constant 0.000000e+00 : f32
    %17 = vector.broadcast %cst : f32 to vector<128x128xf32>
    %18 = arith.maximumf %16, %17 : vector<128x128xf32>
    %c0_10 = arith.constant 0 : index
    %c0_11 = arith.constant 0 : index
    %19 = vector.load %arg5[%c0_10, %c0_11] : memref<128x128xf32, #tpu.memory_space<vmem>>, vector<128x128xf32>
    tpu.vector_store %arg5[%c0_10, %c0_11], %18 {strides = array<i32>} : memref<128x128xf32, #tpu.memory_space<vmem>>, vector<128x128xf32>,
    return
  }
  func.func @transform_0(%arg0: i32) -> (i32, i32) {
    %c0_i32 = arith.constant 0 : i32
    %c0_i32_0 = arith.constant 0 : i32
    return %arg0, %c0_i32 : i32, i32
  }
  func.func @transform_1(%arg0: i32) -> (i32, i32) {
    %c0_i32 = arith.constant 0 : i32
    %c0_i32_0 = arith.constant 0 : i32
    %c0_i32_1 = arith.constant 0 : i32
    return %c0_i32, %c0_i32_0 : i32, i32
  }
  func.func @transform_2(%arg0: i32) -> (i32, i32) {
    %c1_i32 = arith.constant 1 : i32
    %c0_i32 = arith.constant 0 : i32
    return %arg0, %c1_i32 : i32, i32
  }
  func.func @transform_3(%arg0: i32) -> (i32, i32) {
    %c0_i32 = arith.constant 0 : i32
    %c0_i32_0 = arith.constant 0 : i32
    %c0_i32_1 = arith.constant 0 : i32
    return %c0_i32, %c0_i32_0 : i32, i32
  }
  func.func @transform_4(%arg0: i32) -> (i32, i32) {
    %c0_i32 = arith.constant 0 : i32
    %c0_i32_0 = arith.constant 0 : i32
    return %arg0, %c0_i32 : i32, i32
  }
}

</mosaic_0001>

<bundles_post_ra>
// kernel: basic_block_forward.5
= control target key start
LH: loop header
LB: loop body
LE: loop exit
PB: predicated region body
PF: predicated region fallthrough
CT: control target
= control target key end

     0   :  { %s539_s0 = inlined_call_operand.vmem [shape: bf16[128,256], index: 0, kind: input, shape index: {}]   ;;  %s540_s1 = inlined_call_operand.vmem [shape: f32[2,128], index: 1, kind: input, shape index: {}]   ;;  %s541_s2 = inlined_call_operand.vmem [shape: bf16[128,128], index: 2, kind: output, shape index: {}]  }
   0x1   :  { %v24_v0 = vld [vmem:[%s539_s0] sm:$0xf]  ;;  %v26_v1 = vld [vmem:[%s539_s0 + $0x8] sm:$0xf]  ;;  %v28_v2 = vld [vmem:[%s539_s0 + $0x10] sm:$0xf] }
   0x2   :  { %25 = vst [vmem:[#allocation2] sm:$0xf] %v24_v0  ;;  %27 = vst [vmem:[#allocation2 + $0x4] sm:$0xf] %v26_v1  ;;  %v30_v3 = vld [vmem:[%s539_s0 + $0x18] sm:$0xf] }
   0x3   :  { %29 = vst [vmem:[#allocation2 + $0x8] sm:$0xf] %v28_v2  ;;  %v32_v4 = vld [vmem:[%s539_s0 + $0x20] sm:$0xf]  ;;  %v34_v5 = vld [vmem:[%s539_s0 + $0x28] sm:$0xf] }
   0x4   :  { %31 = vst [vmem:[#allocation2 + $0xc] sm:$0xf] %v30_v3  ;;  %33 = vst [vmem:[#allocation2 + $0x10] sm:$0xf] %v32_v4  ;;  %v36_v6 = vld [vmem:[%s539_s0 + $0x30] sm:$0xf] }
   0x5   :  { %35 = vst [vmem:[#allocation2 + $0x14] sm:$0xf] %v34_v5  ;;  %v38_v7 = vld [vmem:[%s539_s0 + $0x38] sm:$0xf]  ;;  %v40_v8 = vld [vmem:[%s539_s0 + $0x40] sm:$0xf] }
   0x6   :  { %37 = vst [vmem:[#allocation2 + $0x18] sm:$0xf] %v36_v6  ;;  %39 = vst [vmem:[#allocation2 + $0x1c] sm:$0xf] %v38_v7  ;;  %v42_v9 = vld [vmem:[%s539_s0 + $0x48] sm:$0xf] }
   0x7   :  { %41 = vst [vmem:[#allocation2 + $0x20] sm:$0xf] %v40_v8  ;;  %v44_v10 = vld [vmem:[%s539_s0 + $0x50] sm:$0xf]  ;;  %v46_v11 = vld [vmem:[%s539_s0 + $0x58] sm:$0xf] }
   0x8   :  { %43 = vst [vmem:[#allocation2 + $0x24] sm:$0xf] %v42_v9  ;;  %45 = vst [vmem:[#allocation2 + $0x28] sm:$0xf] %v44_v10  ;;  %v48_v12 = vld [vmem:[%s539_s0 + $0x60] sm:$0xf] }
   0x9   :  { %47 = vst [vmem:[#allocation2 + $0x2c] sm:$0xf] %v46_v11  ;;  %v50_v13 = vld [vmem:[%s539_s0 + $0x68] sm:$0xf]  ;;  %v52_v14 = vld [vmem:[%s539_s0 + $0x70] sm:$0xf] }
   0xa   :  { %49 = vst [vmem:[#allocation2 + $0x30] sm:$0xf] %v48_v12  ;;  %51 = vst [vmem:[#allocation2 + $0x34] sm:$0xf] %v50_v13  ;;  %v54_v15 = vld [vmem:[%s539_s0 + $0x78] sm:$0xf] }
   0xb   :  { %53 = vst [vmem:[#allocation2 + $0x38] sm:$0xf] %v52_v14  ;;  %55 = vst [vmem:[#allocation2 + $0x3c] sm:$0xf] %v54_v15  ;;  %v325_v16 = vld [vmem:[#allocation2] sm:$0xff]   ;;  %v396_v20 = vld [vmem:[#allocation2 + $0x8] sm:$0xff]  }
   0xc   :  { %v476_v17 = vld [vmem:[%s540_s1] ss:$0 sm:$0xff]  ;;  %v326_v18 = vunpack.c.l.bf16 %v325_v16  ;;  %v327_v19 = vunpack.c.h.bf16 %v325_v16  ;;  %v397_v21 = vld [vmem:[#allocation2 + $0x10] sm:$0xff]   ;;  %v481_v22 = vld [vmem:[%s540_s1 + $0x1] ss:$0 sm:$0xff]  ;;  %v330_v23 = vunpack.c.l.bf16 %v396_v20  ;;  %v331_v24 = vunpack.c.h.bf16 %v396_v20 }
   0xd   :  { %v334_v25 = vunpack.c.l.bf16 %v397_v21  ;;  %v335_v26 = vunpack.c.h.bf16 %v397_v21  ;;  %v398_v27 = vld [vmem:[#allocation2 + $0x18] sm:$0xff]  }
   0xe   :  { %v149_v28 = vmul.f32 %v326_v18, %v476_v17  ;;  %v150_v29 = vmul.f32 %v327_v19, %v476_v17  ;;  %v338_v30 = vunpack.c.l.bf16 %v398_v27  ;;  %v339_v31 = vunpack.c.h.bf16 %v398_v27 }
   0xf   :  { %v151_v32 = vmul.f32 %v330_v23, %v476_v17  ;;  %v152_v33 = vmul.f32 %v331_v24, %v476_v17  ;;  %v153_v34 = vmul.f32 %v334_v25, %v476_v17  ;;  %v154_v35 = vmul.f32 %v335_v26, %v476_v17  ;;  %v399_v44 = vld [vmem:[#allocation2 + $0x20] sm:$0xff]  }
  0x10   :  { %v170_v36 = vadd.f32 %v481_v22, %v149_v28  ;;  %v171_v37 = vadd.f32 %v481_v22, %v150_v29  ;;  %v155_v38 = vmul.f32 %v338_v30, %v476_v17  ;;  %v156_v39 = vmul.f32 %v339_v31, %v476_v17  ;;  %v400_v49 = vld [vmem:[#allocation2 + $0x28] sm:$0xff]  }
  0x11   :  { %v172_v40 = vadd.f32 %v481_v22, %v151_v32  ;;  %v173_v41 = vadd.f32 %v481_v22, %v152_v33  ;;  %v174_v42 = vadd.f32 %v481_v22, %v153_v34  ;;  %v175_v43 = vadd.f32 %v481_v22, %v154_v35  ;;  %v401_v54 = vld [vmem:[#allocation2 + $0x30] sm:$0xff]  }
  0x12   :  { %v186_v45 = vmax.f32 %v170_v36, 0.0  ;;  %v187_v46 = vmax.f32 %v171_v37, 0.0  ;;  %v176_v47 = vadd.f32 %v481_v22, %v155_v38  ;;  %v177_v48 = vadd.f32 %v481_v22, %v156_v39  ;;  %v402_v59 = vld [vmem:[#allocation2 + $0x38] sm:$0xff]  }
  0x13   :  { %v188_v50 = vmax.f32 %v172_v40, 0.0  ;;  %v189_v51 = vmax.f32 %v173_v41, 0.0  ;;  %v190_v52 = vmax.f32 %v174_v42, 0.0  ;;  %v191_v53 = vmax.f32 %v175_v43, 0.0 }
  0x14   :  { %v359_v55 = vpack.c.bf16 %v187_v46, %v186_v45  ;;  %v192_v56 = vmax.f32 %v176_v47, 0.0  ;;  %v193_v57 = vmax.f32 %v177_v48, 0.0  ;;  %v342_v58 = vunpack.c.l.bf16 %v399_v44 }
  0x15   :  { %v364_v60 = vpack.c.bf16 %v189_v51, %v188_v50  ;;  %v369_v61 = vpack.c.bf16 %v191_v53, %v190_v52  ;;  %v343_v62 = vunpack.c.h.bf16 %v399_v44  ;;  %v346_v63 = vunpack.c.l.bf16 %v400_v49 }
  0x16   :  { %360 = vst [vmem:[%s541_s2] sm:$0xff] %v359_v55   ;;  %v374_v0 = vpack.c.bf16 %v193_v57, %v192_v56  ;;  %v157_v1 = vmul.f32 %v342_v58, %v476_v17  ;;  %v347_v2 = vunpack.c.h.bf16 %v400_v49  ;;  %v350_v3 = vunpack.c.l.bf16 %v401_v54 }
  0x17   :  { %403 = vst [vmem:[%s541_s2 + $0x8] sm:$0xff] %v364_v60   ;;  %404 = vst [vmem:[%s541_s2 + $0x10] sm:$0xff] %v369_v61   ;;  %v158_v4 = vmul.f32 %v343_v62, %v476_v17  ;;  %v159_v5 = vmul.f32 %v346_v63, %v476_v17  ;;  %v351_v6 = vunpack.c.h.bf16 %v401_v54  ;;  %v354_v7 = vunpack.c.l.bf16 %v402_v59 }
  0x18   :  { %405 = vst [vmem:[%s541_s2 + $0x18] sm:$0xff] %v374_v0   ;;  %v178_v8 = vadd.f32 %v481_v22, %v157_v1  ;;  %v160_v9 = vmul.f32 %v347_v2, %v476_v17  ;;  %v161_v10 = vmul.f32 %v350_v3, %v476_v17  ;;  %v355_v11 = vunpack.c.h.bf16 %v402_v59 }
  0x19   :  { %v179_v12 = vadd.f32 %v481_v22, %v158_v4  ;;  %v180_v13 = vadd.f32 %v481_v22, %v159_v5  ;;  %v162_v14 = vmul.f32 %v351_v6, %v476_v17  ;;  %v163_v15 = vmul.f32 %v354_v7, %v476_v17 }
  0x1a   :  { %v194_v16 = vmax.f32 %v178_v8, 0.0  ;;  %v181_v18 = vadd.f32 %v481_v22, %v160_v9  ;;  %v182_v19 = vadd.f32 %v481_v22, %v161_v10  ;;  %v164_v20 = vmul.f32 %v355_v11, %v476_v17 }
  0x1b   :  { %v195_v21 = vmax.f32 %v179_v12, 0.0  ;;  %v196_v23 = vmax.f32 %v180_v13, 0.0  ;;  %v183_v24 = vadd.f32 %v481_v22, %v162_v14  ;;  %v184_v25 = vadd.f32 %v481_v22, %v163_v15 }
  0x1c   :  { %v197_v26 = vmax.f32 %v181_v18, 0.0  ;;  %v198_v27 = vmax.f32 %v182_v19, 0.0  ;;  %v185_v28 = vadd.f32 %v481_v22, %v164_v20 }
  0x1d   :  { %v379_v29 = vpack.c.bf16 %v195_v21, %v194_v16  ;;  %v199_v30 = vmax.f32 %v183_v24, 0.0  ;;  %v200_v31 = vmax.f32 %v184_v25, 0.0 }
  0x1e   :  { %v384_v32 = vpack.c.bf16 %v197_v26, %v196_v23  ;;  %v201_v33 = vmax.f32 %v185_v28, 0.0 }
  0x1f   :  { %406 = vst [vmem:[%s541_s2 + $0x20] sm:$0xff] %v379_v29   ;;  %v389_v17 = vpack.c.bf16 %v199_v30, %v198_v27 }
  0x20   :  { %407 = vst [vmem:[%s541_s2 + $0x28] sm:$0xff] %v384_v32   ;;  %v394_v34 = vpack.c.bf16 %v201_v33, %v200_v31 }
  0x21   :  { %408 = vst [vmem:[%s541_s2 + $0x30] sm:$0xff] %v389_v17  }
  0x22   :  { %409 = vst [vmem:[%s541_s2 + $0x38] sm:$0xff] %v394_v34  }

// kernel: basic_block_forward.4
= control target key start
LH: loop header
LB: loop body
LE: loop exit
PB: predicated region body
PF: predicated region fallthrough
CT: control target
= control target key end

     0   :  { %v675_v1 = vmov 0   ;;  %s909_s1 = inlined_call_operand.vmem [shape: bf16[128,256], index: 1, kind: input, shape index: {}]   ;;  %s910_s0 = inlined_call_operand.vmem [shape: bf16[128,128], index: 0, kind: input, shape index: {}]   ;;  %s911_s2 = inlined_call_operand.vmem [shape: bf16[128,256], index: 2, kind: output, shape index: {0}]   ;;  %s912_s3 = inlined_call_operand.vmem [shape: f32[8,256], index: 3, kind: output, shape index: {1}]  }
   0x1   :  { %v643_v0 = vld [vmem:[%s909_s1 + $0x4] ss:$8 sps:$4 sm:$0xff]   ;;  %206 = vmatprep.mubr.bf16.mxu0 %v675_v1  ;;  %246 = vmatprep.mubr.bf16.mxu1 %v675_v1  ;;  %v645_v2 = vld [vmem:[%s909_s1] ss:$8 sps:$4 sm:$0xff]   ;;  %v646_v3 = vld [vmem:[%s909_s1 + $0x14] ss:$8 sps:$4 sm:$0xff]  }
   0x2   :  { %174 = vmatprep.subr.bf16.mxu0 %v643_v0  ;;  %625 = vmatprep.subr.bf16.mxu1 %v643_v0  ;;  %v648_v4 = vld [vmem:[%s909_s1 + $0x10] ss:$8 sps:$4 sm:$0xff]   ;;  %v649_v5 = vld [vmem:[%s909_s1 + $0x24] ss:$8 sps:$4 sm:$0xff]   ;;  %v651_v6 = vld [vmem:[%s909_s1 + $0x20] ss:$8 sps:$4 sm:$0xff]  }
   0x3   :  { %175 = vmatpush1.bf16.msra.mxu0 %v645_v2  ;;  %633 = vmatpush1.bf16.msra.mxu1 %v645_v2  ;;  %v652_v7 = vld [vmem:[%s909_s1 + $0x34] ss:$8 sps:$4 sm:$0xff]   ;;  %v654_v8 = vld [vmem:[%s909_s1 + $0x30] ss:$8 sps:$4 sm:$0xff]   ;;  %v655_v9 = vld [vmem:[%s909_s1 + $0x44] ss:$8 sps:$4 sm:$0xff]  }
   0x4   :  { %176 = vmatprep.subr.bf16.mxu0 %v646_v3  ;;  %626 = vmatprep.subr.bf16.mxu1 %v646_v3  ;;  %v657_v10 = vld [vmem:[%s909_s1 + $0x40] ss:$8 sps:$4 sm:$0xff]   ;;  %v658_v11 = vld [vmem:[%s909_s1 + $0x54] ss:$8 sps:$4 sm:$0xff]   ;;  %v660_v12 = vld [vmem:[%s909_s1 + $0x50] ss:$8 sps:$4 sm:$0xff]  }
   0x5   :  { %v661_v13 = vld [vmem:[%s909_s1 + $0x64] ss:$8 sps:$4 sm:$0xff]   ;;  %v663_v14 = vld [vmem:[%s909_s1 + $0x60] ss:$8 sps:$4 sm:$0xff]   ;;  %v664_v15 = vld [vmem:[%s909_s1 + $0x74] ss:$8 sps:$4 sm:$0xff]  }
   0x6   :  { %v666_v16 = vld [vmem:[%s909_s1 + $0x70] ss:$8 sps:$4 sm:$0xff]   ;;  %v667_v17 = vld [vmem:[%s910_s0] sm:$0xff]   ;;  %v668_v19 = vld [vmem:[%s910_s0 + $0x8] sm:$0xff]  }
   0x7   :  { %177 = vmatpush1.bf16.msra.mxu0 %v648_v4  ;;  %634 = vmatpush1.bf16.msra.mxu1 %v648_v4  ;;  %v669_v18 = vld [vmem:[%s910_s0 + $0x20] sm:$0xff]   ;;  %v671_v20 = vld [vmem:[%s910_s0 + $0x28] sm:$0xff]   ;;  %v670_v21 = vld [vmem:[%s910_s0 + $0x10] sm:$0xff]  }
   0x8   :  { %178 = vmatprep.subr.bf16.mxu0 %v649_v5  ;;  %627 = vmatprep.subr.bf16.mxu1 %v649_v5  ;;  %v673_v22 = vld [vmem:[%s910_s0 + $0x30] sm:$0xff]   ;;  %v672_v23 = vld [vmem:[%s910_s0 + $0x18] sm:$0xff]  }
   0x9   :  { %v674_v24 = vld [vmem:[%s910_s0 + $0x38] sm:$0xff]  }
   0xb   :  { %179 = vmatpush1.bf16.msra.mxu0 %v651_v6  ;;  %635 = vmatpush1.bf16.msra.mxu1 %v651_v6 }
   0xc   :  { %180 = vmatprep.subr.bf16.mxu0 %v652_v7  ;;  %628 = vmatprep.subr.bf16.mxu1 %v652_v7 }
   0xf   :  { %181 = vmatpush1.bf16.msra.mxu0 %v654_v8  ;;  %636 = vmatpush1.bf16.msra.mxu1 %v654_v8 }
  0x10   :  { %182 = vmatprep.subr.bf16.mxu0 %v655_v9  ;;  %629 = vmatprep.subr.bf16.mxu1 %v655_v9 }
  0x13   :  { %183 = vmatpush1.bf16.msra.mxu0 %v657_v10  ;;  %637 = vmatpush1.bf16.msra.mxu1 %v657_v10 }
  0x14   :  { %184 = vmatprep.subr.bf16.mxu0 %v658_v11  ;;  %630 = vmatprep.subr.bf16.mxu1 %v658_v11 }
  0x17   :  { %185 = vmatpush1.bf16.msra.mxu0 %v660_v12  ;;  %638 = vmatpush1.bf16.msra.mxu1 %v660_v12 }
  0x18   :  { %186 = vmatprep.subr.bf16.mxu0 %v661_v13  ;;  %631 = vmatprep.subr.bf16.mxu1 %v661_v13 }
  0x1b   :  { %187 = vmatpush1.bf16.msra.mxu0 %v663_v14  ;;  %639 = vmatpush1.bf16.msra.mxu1 %v663_v14 }
  0x1c   :  { %188 = vmatprep.subr.bf16.mxu0 %v664_v15  ;;  %632 = vmatprep.subr.bf16.mxu1 %v664_v15 }
  0x1f   :  { %189 = vmatpush1.bf16.msra.mxu0 %v666_v16  ;;  %640 = vmatpush1.bf16.msra.mxu1 %v666_v16 }
  0x22   :  { %207 = vmatmul.mubr.bf16.vlgmr.msra.gmra.mrb[0].mxu0 %v667_v17  ;;  %247 = vmatmul.mubr.bf16.vlgmr.msra.gmra.mrb[0].mxu1 %v669_v18 }
  0x23   :  { %216 = vmatprep.mubr.bf16.mxu0 %v675_v1  ;;  %256 = vmatprep.mubr.bf16.mxu1 %v675_v1 }
  0x2a   :  { %217 = vmatmul.mubr.bf16.gmra.mrb[4].mxu0 %v668_v19  ;;  %257 = vmatmul.mubr.bf16.gmra.mrb[4].mxu1 %v671_v20 }
  0x2b   :  { %226 = vmatprep.mubr.bf16.mxu0 %v675_v1  ;;  %266 = vmatprep.mubr.bf16.mxu1 %v675_v1 }
  0x32   :  { %227 = vmatmul.mubr.bf16.gmra.mrb[8].mxu0 %v670_v21  ;;  %267 = vmatmul.mubr.bf16.gmra.mrb[8].mxu1 %v673_v22 }
  0x33   :  { %236 = vmatprep.mubr.bf16.mxu0 %v675_v1  ;;  %276 = vmatprep.mubr.bf16.mxu1 %v675_v1 }
  0x3a   :  { %237 = vmatmul.mubr.bf16.gmra.mrb[12].mxu0 %v672_v23  ;;  %277 = vmatmul.mubr.bf16.gmra.mrb[12].mxu1 %v674_v24 }
  0xf5   :  { %v208_v25 = vpop.f32.mrb[0].mxu0  ;;  %v777_v26 = vpop.f32.mrb[0].mxu1 }
  0xf6   :  { %v210_v27 = vpop.f32.mrb[1].mxu0  ;;  %v779_v28 = vpop.f32.mrb[1].mxu1  ;;  %v465_v33 = vmul.f32 %v208_v25, %v208_v25 }
  0xf7   :  { %v609_v29 = vpack.c.bf16 %v210_v27, %v208_v25  ;;  %v212_v30 = vpop.f32.mrb[2].mxu0  ;;  %v617_v31 = vpack.c.bf16 %v779_v28, %v777_v26  ;;  %v783_v32 = vpop.f32.mrb[2].mxu1  ;;  %v466_v34 = vmul.f32 %v210_v27, %v210_v27 }
  0xf8   :  { %v399_v35 = vadd.f32 %v212_v30, %v208_v25  ;;  %v467_v36 = vmul.f32 %v212_v30, %v212_v30  ;;  %v214_v37 = vpop.f32.mrb[3].mxu0  ;;  %v785_v38 = vpop.f32.mrb[3].mxu1 }
  0xf9   :  { %383 = vst [vmem:[%s911_s2] sm:$0xff] %v609_v29  ;;  %v610_v39 = vpack.c.bf16 %v214_v37, %v212_v30  ;;  %v420_v40 = vadd.f32 %v214_v37, %v210_v27  ;;  %v468_v41 = vmul.f32 %v214_v37, %v214_v37  ;;  %391 = vst [vmem:[%s911_s2 + $0x40] sm:$0xff] %v617_v31 }
  0xfa   :  { %v618_v42 = vpack.c.bf16 %v785_v38, %v783_v32  ;;  %v497_v43 = vadd.f32 %v467_v36, %v465_v33 }
  0xfb   :  { %384 = vst [vmem:[%s911_s2 + $0x8] sm:$0xff] %v610_v39  ;;  %v518_v44 = vadd.f32 %v468_v41, %v466_v34 }
  0xfc   :  { %392 = vst [vmem:[%s911_s2 + $0x48] sm:$0xff] %v618_v42 }
  0xfd   :  { %v218_v45 = vpop.f32.mrb[4].mxu0  ;;  %v801_v46 = vpop.f32.mrb[4].mxu1 }
  0xfe   :  { %v400_v47 = vadd.f32 %v399_v35, %v218_v45  ;;  %v469_v48 = vmul.f32 %v218_v45, %v218_v45  ;;  %v220_v49 = vpop.f32.mrb[5].mxu0  ;;  %v803_v50 = vpop.f32.mrb[5].mxu1 }
  0xff   :  { %v611_v51 = vpack.c.bf16 %v220_v49, %v218_v45  ;;  %v421_v52 = vadd.f32 %v420_v40, %v220_v49  ;;  %v470_v53 = vmul.f32 %v220_v49, %v220_v49  ;;  %v222_v54 = vpop.f32.mrb[6].mxu0  ;;  %v619_v55 = vpack.c.bf16 %v803_v50, %v801_v46  ;;  %v807_v56 = vpop.f32.mrb[6].mxu1 }
 0x100   :  { %v498_v57 = vadd.f32 %v497_v43, %v469_v48  ;;  %v401_v58 = vadd.f32 %v400_v47, %v222_v54  ;;  %v471_v59 = vmul.f32 %v222_v54, %v222_v54  ;;  %v224_v60 = vpop.f32.mrb[7].mxu0  ;;  %v809_v61 = vpop.f32.mrb[7].mxu1 }
 0x101   :  { %385 = vst [vmem:[%s911_s2 + $0x10] sm:$0xff] %v611_v51  ;;  %v519_v62 = vadd.f32 %v518_v44, %v470_v53  ;;  %v612_v63 = vpack.c.bf16 %v224_v60, %v222_v54  ;;  %v422_v0 = vadd.f32 %v421_v52, %v224_v60  ;;  %v472_v1 = vmul.f32 %v224_v60, %v224_v60 }
 0x102   :  { %393 = vst [vmem:[%s911_s2 + $0x50] sm:$0xff] %v619_v55  ;;  %v499_v2 = vadd.f32 %v498_v57, %v471_v59  ;;  %v620_v3 = vpack.c.bf16 %v809_v61, %v807_v56  ;;  %v481_v57 = vmul.f32 %v777_v26, %v777_v26 }
 0x103   :  { %386 = vst [vmem:[%s911_s2 + $0x18] sm:$0xff] %v612_v63  ;;  %v520_v4 = vadd.f32 %v519_v62, %v472_v1  ;;  %v482_v62 = vmul.f32 %v779_v28, %v779_v28  ;;  %v483_v1 = vmul.f32 %v783_v32, %v783_v32 }
 0x104   :  { %394 = vst [vmem:[%s911_s2 + $0x58] sm:$0xff] %v620_v3 }
 0x105   :  { %v228_v5 = vpop.f32.mrb[8].mxu0  ;;  %v825_v6 = vpop.f32.mrb[8].mxu1 }
 0x106   :  { %v402_v7 = vadd.f32 %v401_v58, %v228_v5  ;;  %v473_v8 = vmul.f32 %v228_v5, %v228_v5  ;;  %v230_v9 = vpop.f32.mrb[9].mxu0  ;;  %v827_v10 = vpop.f32.mrb[9].mxu1 }
 0x107   :  { %v613_v11 = vpack.c.bf16 %v230_v9, %v228_v5  ;;  %v423_v12 = vadd.f32 %v422_v0, %v230_v9  ;;  %v474_v13 = vmul.f32 %v230_v9, %v230_v9  ;;  %v232_v14 = vpop.f32.mrb[10].mxu0  ;;  %v621_v15 = vpack.c.bf16 %v827_v10, %v825_v6  ;;  %v831_v16 = vpop.f32.mrb[10].mxu1 }
 0x108   :  { %v500_v17 = vadd.f32 %v499_v2, %v473_v8  ;;  %v403_v18 = vadd.f32 %v402_v7, %v232_v14  ;;  %v475_v19 = vmul.f32 %v232_v14, %v232_v14  ;;  %v234_v20 = vpop.f32.mrb[11].mxu0  ;;  %v833_v21 = vpop.f32.mrb[11].mxu1 }
 0x109   :  { %387 = vst [vmem:[%s911_s2 + $0x20] sm:$0xff] %v613_v11  ;;  %v521_v22 = vadd.f32 %v520_v4, %v474_v13  ;;  %v614_v23 = vpack.c.bf16 %v234_v20, %v232_v14  ;;  %v424_v24 = vadd.f32 %v423_v12, %v234_v20  ;;  %v476_v25 = vmul.f32 %v234_v20, %v234_v20 }
 0x10a   :  { %395 = vst [vmem:[%s911_s2 + $0x60] sm:$0xff] %v621_v15  ;;  %v501_v27 = vadd.f32 %v500_v17, %v475_v19  ;;  %v622_v29 = vpack.c.bf16 %v833_v21, %v831_v16  ;;  %v487_v12 = vmul.f32 %v807_v56, %v807_v56  ;;  %v490_v20 = vmul.f32 %v827_v10, %v827_v10 }
 0x10b   :  { %388 = vst [vmem:[%s911_s2 + $0x28] sm:$0xff] %v614_v23  ;;  %v522_v30 = vadd.f32 %v521_v22, %v476_v25 }
 0x10c   :  { %396 = vst [vmem:[%s911_s2 + $0x68] sm:$0xff] %v622_v29 }
 0x10d   :  { %v238_v31 = vpop.f32.mrb[12].mxu0  ;;  %v849_v33 = vpop.f32.mrb[12].mxu1 }
 0x10e   :  { %v404_v34 = vadd.f32 %v403_v18, %v238_v31  ;;  %v477_v35 = vmul.f32 %v238_v31, %v238_v31  ;;  %v240_v36 = vpop.f32.mrb[13].mxu0  ;;  %v280_v37 = vpop.f32.mrb[13].mxu1  ;;  %v489_v18 = vmul.f32 %v825_v6, %v825_v6 }
 0x10f   :  { %v615_v39 = vpack.c.bf16 %v240_v36, %v238_v31  ;;  %v425_v40 = vadd.f32 %v424_v24, %v240_v36  ;;  %v478_v41 = vmul.f32 %v240_v36, %v240_v36  ;;  %v242_v42 = vpop.f32.mrb[14].mxu0  ;;  %v623_v43 = vpack.c.bf16 %v280_v37, %v849_v33  ;;  %v282_v44 = vpop.f32.mrb[14].mxu1 }
 0x110   :  { %v502_v45 = vadd.f32 %v501_v27, %v477_v35  ;;  %v405_v47 = vadd.f32 %v404_v34, %v242_v42  ;;  %v479_v48 = vmul.f32 %v242_v42, %v242_v42  ;;  %v244_v49 = vpop.f32.mrb[15].mxu0  ;;  %v284_v51 = vpop.f32.mrb[15].mxu1  ;;  %v491_v24 = vmul.f32 %v831_v16, %v831_v16 }
 0x111   :  { %389 = vst [vmem:[%s911_s2 + $0x30] sm:$0xff] %v615_v39  ;;  %v523_v52 = vadd.f32 %v522_v30, %v478_v41  ;;  %v616_v53 = vpack.c.bf16 %v244_v49, %v242_v42  ;;  %v426_v54 = vadd.f32 %v425_v40, %v244_v49  ;;  %v480_v55 = vmul.f32 %v244_v49, %v244_v49 }
 0x112   :  { %397 = vst [vmem:[%s911_s2 + $0x70] sm:$0xff] %v623_v43  ;;  %v406_v58 = vadd.f32 %v405_v47, %v777_v26  ;;  %v503_v59 = vadd.f32 %v502_v45, %v479_v48  ;;  %v624_v60 = vpack.c.bf16 %v284_v51, %v282_v44  ;;  %v484_v26 = vmul.f32 %v785_v38, %v785_v38 }
 0x113   :  { %390 = vst [vmem:[%s911_s2 + $0x38] sm:$0xff] %v616_v53  ;;  %v427_v63 = vadd.f32 %v426_v54, %v779_v28  ;;  %v524_v0 = vadd.f32 %v523_v52, %v480_v55  ;;  %v485_v28 = vmul.f32 %v801_v46, %v801_v46  ;;  %v494_v29 = vmul.f32 %v280_v37, %v280_v37 }
 0x114   :  { %v407_v2 = vadd.f32 %v406_v58, %v783_v32  ;;  %v504_v3 = vadd.f32 %v503_v59, %v481_v57  ;;  %398 = vst [vmem:[%s911_s2 + $0x78] sm:$0xff] %v624_v60  ;;  %v486_v32 = vmul.f32 %v803_v50, %v803_v50  ;;  %v495_v39 = vmul.f32 %v282_v44, %v282_v44 }
 0x115   :  { %v428_v4 = vadd.f32 %v427_v63, %v785_v38  ;;  %v525_v5 = vadd.f32 %v524_v0, %v482_v62  ;;  %v488_v38 = vmul.f32 %v809_v61, %v809_v61  ;;  %v496_v41 = vmul.f32 %v284_v51, %v284_v51 }
 0x116   :  { %v505_v7 = vadd.f32 %v504_v3, %v483_v1  ;;  %v408_v8 = vadd.f32 %v407_v2, %v801_v46  ;;  %v447_v54 = vlaneseq }
 0x117   :  { %v526_v9 = vadd.f32 %v525_v5, %v484_v26  ;;  %v429_v11 = vadd.f32 %v428_v4, %v803_v50 }
 0x118   :  { %v409_v13 = vadd.f32 %v408_v8, %v807_v56  ;;  %v506_v14 = vadd.f32 %v505_v7, %v485_v28  ;;  %vm461_vm0 = vcmp.lt.s32.totalorder %v447_v54, 256 }
 0x119   :  { %v430_v15 = vadd.f32 %v429_v11, %v809_v61  ;;  %v527_v17 = vadd.f32 %v526_v9, %v486_v32  ;;  %v493_v61 = vmul.f32 %v849_v33, %v849_v33 }
 0x11a   :  { %v410_v46 = vadd.f32 %v409_v13, %v825_v6  ;;  %v507_v19 = vadd.f32 %v506_v14, %v487_v12  ;;  %v492_v6 = vmul.f32 %v833_v21, %v833_v21 }
 0x11b   :  { %v431_v50 = vadd.f32 %v430_v15, %v827_v10  ;;  %v528_v22 = vadd.f32 %v527_v17, %v488_v38 }
 0x11c   :  { %v508_v56 = vadd.f32 %v507_v19, %v489_v18  ;;  %v411_v23 = vadd.f32 %v410_v46, %v831_v16 }
 0x11d   :  { %v529_v25 = vadd.f32 %v528_v22, %v490_v20  ;;  %v432_v27 = vadd.f32 %v431_v50, %v833_v21  ;;  %v676_v21 = vmov 1966171168  }
 0x11e   :  { %v509_v30 = vadd.f32 %v508_v56, %v491_v24  ;;  %v412_v10 = vadd.f32 %v411_v23, %v849_v33  ;;  %v445_v53 = vunpack.c.l.s4 %v676_v21 }
 0x11f   :  { %v530_v31 = vadd.f32 %v529_v25, %v492_v6  ;;  %v433_v34 = vadd.f32 %v432_v27, %v280_v37 }
 0x120   :  { %v510_v35 = vadd.f32 %v509_v30, %v493_v61  ;;  %v413_v36 = vadd.f32 %v412_v10, %v282_v44  ;;  %v446_v62 = vunpack.c.0.s8 %v445_v53 }
 0x121   :  { %v531_v40 = vadd.f32 %v530_v31, %v494_v29  ;;  %v434_v16 = vadd.f32 %v433_v34, %v284_v51  ;;  %v448_v51 = vshrl.u32 %v447_v54, 7 }
 0x122   :  { %v414_v42 = vrot.slane %v413_v36, 4  ;;  %v511_v43 = vadd.f32 %v510_v35, %v495_v39 }
 0x123   :  { %v435_v45 = vrot.slane %v434_v16, 4  ;;  %v532_v47 = vadd.f32 %v531_v40, %v496_v41  ;;  %v449_v28 = vsub.s32 %v446_v62, %v448_v51 }
 0x124   :  { %v415_v48 = vadd.f32 %v414_v42, %v413_v36  ;;  %v512_v49 = vrot.slane %v511_v43, 4 }
 0x125   :  { %v436_v52 = vadd.f32 %v435_v45, %v434_v16  ;;  %v533_v55 = vrot.slane %v532_v47, 4 }
 0x126   :  { %v416_v33 = vrot.slane %v415_v48, 2  ;;  %v513_v57 = vadd.f32 %v512_v49, %v511_v43 }
 0x127   :  { %v437_v37 = vrot.slane %v436_v52, 2  ;;  %v534_v58 = vadd.f32 %v533_v55, %v532_v47 }
 0x128   :  { %v417_v59 = vadd.f32 %v416_v33, %v415_v48  ;;  %v514_v44 = vrot.slane %v513_v57, 2 }
 0x129   :  { %v438_v60 = vadd.f32 %v437_v37, %v436_v52  ;;  %v535_v63 = vrot.slane %v534_v58, 2 }
 0x12a   :  { %v418_v0 = vrot.slane %v417_v59, 1  ;;  %v515_v1 = vadd.f32 %v514_v44, %v513_v57 }
 0x12b   :  { %v439_v2 = vrot.slane %v438_v60, 1  ;;  %v536_v3 = vadd.f32 %v535_v63, %v534_v58 }
 0x12c   :  { %v419_v26 = vadd.f32 %v418_v0, %v417_v59  ;;  %v516_v4 = vrot.slane %v515_v1, 1 }
 0x12d   :  { %v440_v5 = vadd.f32 %v439_v2, %v438_v60  ;;  %v537_v7 = vrot.slane %v536_v3, 1 }
 0x12e   :  { %v517_v8 = vadd.f32 %v516_v4, %v515_v1 }
 0x12f   :  { %v443_v32 = vcombine.low %v419_v26, %v440_v5  ;;  %v538_v9 = vadd.f32 %v537_v7, %v536_v3 }
 0x131   :  { %v450_v11 = vrot.slane %v443_v32, %v449_v28  ;;  %v541_v12 = vcombine.low %v517_v8, %v538_v9 }
 0x133   :  { %v457_v13 = vrot.slane %v450_v11, %v449_v28  ;;  %v548_v14 = vrot.slane %v541_v12, %v449_v28 }
 0x135   :  { %463 = vst.msk [vmem:[%s912_s3] ss:$8 sm:$0x3] %vm461_vm0, %v457_v13  ;;  %v555_v38 = vrot.slane %v548_v14, %v449_v28 }
 0x137   :  { %608 = vst.msk [vmem:[%s912_s3 + $0x1] ss:$8 sm:$0x3] %vm461_vm0, %v555_v38 }

// kernel: basic_block_forward.6
= control target key start
LH: loop header
LB: loop body
LE: loop exit
PB: predicated region body
PF: predicated region fallthrough
CT: control target
= control target key end

     0   :  { %s660_s1 = inlined_call_operand.vmem [shape: bf16[128,128], index: 1, kind: input, shape index: {}]   ;;  %s661_s0 = inlined_call_operand.vmem [shape: bf16[128,128], index: 0, kind: input, shape index: {}]   ;;  %s662_s2 = inlined_call_operand.vmem [shape: bf16[128,128], index: 2, kind: output, shape index: {0}]   ;;  %s663_s3 = inlined_call_operand.vmem [shape: f32[8,128], index: 3, kind: output, shape index: {1}]  }
   0x1   :  { %v546_v0 = vld [vmem:[%s660_s1] sm:$0xff]   ;;  %v547_v1 = vld [vmem:[%s660_s1 + $0x8] sm:$0xff]   ;;  %v548_v2 = vld [vmem:[%s660_s1 + $0x10] sm:$0xff]  }
   0x2   :  { %498 = vmatprep.subr.bf16.mxu0 %v546_v0  ;;  %530 = vmatprep.subr.bf16.mxu1 %v546_v0  ;;  %v549_v3 = vld [vmem:[%s660_s1 + $0x18] sm:$0xff]   ;;  %v554_v4 = vld [vmem:[%s661_s0] sm:$0xff]   ;;  %v551_v7 = vld [vmem:[%s660_s1 + $0x28] sm:$0xff]  }
   0x3   :  { %499 = vmatpush3.bf16.msra.mxu0 %v546_v0  ;;  %538 = vmatpush3.bf16.msra.mxu1 %v546_v0  ;;  %v550_v5 = vld [vmem:[%s660_s1 + $0x20] sm:$0xff]   ;;  %v552_v8 = vld [vmem:[%s660_s1 + $0x30] sm:$0xff]   ;;  %v553_v9 = vld [vmem:[%s660_s1 + $0x38] sm:$0xff]  }
   0x4   :  { %500 = vmatprep.subr.bf16.mxu0 %v547_v1  ;;  %531 = vmatprep.subr.bf16.mxu1 %v547_v1  ;;  %v558_v6 = vld [vmem:[%s661_s0 + $0x20] sm:$0xff]   ;;  %v555_v10 = vld [vmem:[%s661_s0 + $0x8] sm:$0xff]   ;;  %v556_v12 = vld [vmem:[%s661_s0 + $0x10] sm:$0xff]  }
   0x5   :  { %514 = vmatprep.mubr.bf16.mxu0 %v554_v4  ;;  %522 = vmatprep.mubr.bf16.mxu1 %v558_v6  ;;  %v559_v11 = vld [vmem:[%s661_s0 + $0x28] sm:$0xff]   ;;  %v560_v13 = vld [vmem:[%s661_s0 + $0x30] sm:$0xff]   ;;  %v557_v14 = vld [vmem:[%s661_s0 + $0x18] sm:$0xff]  }
   0x6   :  { %v561_v15 = vld [vmem:[%s661_s0 + $0x38] sm:$0xff]  }
   0x7   :  { %501 = vmatpush3.bf16.msra.mxu0 %v547_v1  ;;  %539 = vmatpush3.bf16.msra.mxu1 %v547_v1 }
   0x8   :  { %502 = vmatprep.subr.bf16.mxu0 %v548_v2  ;;  %532 = vmatprep.subr.bf16.mxu1 %v548_v2 }
   0xb   :  { %503 = vmatpush3.bf16.msra.mxu0 %v548_v2  ;;  %540 = vmatpush3.bf16.msra.mxu1 %v548_v2 }
   0xc   :  { %504 = vmatprep.subr.bf16.mxu0 %v549_v3  ;;  %533 = vmatprep.subr.bf16.mxu1 %v549_v3 }
   0xf   :  { %505 = vmatpush3.bf16.msra.mxu0 %v549_v3  ;;  %541 = vmatpush3.bf16.msra.mxu1 %v549_v3 }
  0x10   :  { %506 = vmatprep.subr.bf16.mxu0 %v550_v5  ;;  %534 = vmatprep.subr.bf16.mxu1 %v550_v5 }
  0x13   :  { %507 = vmatpush3.bf16.msra.mxu0 %v550_v5  ;;  %542 = vmatpush3.bf16.msra.mxu1 %v550_v5 }
  0x14   :  { %508 = vmatprep.subr.bf16.mxu0 %v551_v7  ;;  %535 = vmatprep.subr.bf16.mxu1 %v551_v7 }
  0x17   :  { %509 = vmatpush3.bf16.msra.mxu0 %v551_v7  ;;  %543 = vmatpush3.bf16.msra.mxu1 %v551_v7 }
  0x18   :  { %510 = vmatprep.subr.bf16.mxu0 %v552_v8  ;;  %536 = vmatprep.subr.bf16.mxu1 %v552_v8 }
  0x1b   :  { %511 = vmatpush3.bf16.msra.mxu0 %v552_v8  ;;  %544 = vmatpush3.bf16.msra.mxu1 %v552_v8 }
  0x1c   :  { %512 = vmatprep.subr.bf16.mxu0 %v553_v9  ;;  %537 = vmatprep.subr.bf16.mxu1 %v553_v9 }
  0x1f   :  { %513 = vmatpush3.bf16.msra.mxu0 %v553_v9  ;;  %545 = vmatpush3.bf16.msra.mxu1 %v553_v9 }
  0x22   :  { %515 = vmatmul.mubr.bf16.vlgmr.msra.gmra.mrb[0].mxu0 %v555_v10  ;;  %523 = vmatmul.mubr.bf16.vlgmr.msra.gmra.mrb[0].mxu1 %v559_v11 }
  0x23   :  { %518 = vmatprep.mubr.bf16.mxu0 %v556_v12  ;;  %526 = vmatprep.mubr.bf16.mxu1 %v560_v13 }
  0x2a   :  { %519 = vmatmul.mubr.bf16.gmra.mrb[4].mxu0 %v557_v14  ;;  %527 = vmatmul.mubr.bf16.gmra.mrb[4].mxu1 %v561_v15 }
  0xf5   :  { %v516_v16 = vpop.f32.mrb[0].mxu0  ;;  %v524_v17 = vpop.f32.mrb[0].mxu1 }
  0xf6   :  { %v176_v18 = vpop.f32.mrb[1].mxu0  ;;  %v208_v19 = vpop.f32.mrb[1].mxu1  ;;  %v343_v31 = vmul.f32 %v516_v16, %v516_v16  ;;  %v351_v3 = vmul.f32 %v524_v17, %v524_v17 }
  0xf7   :  { %v517_v20 = vpop.f32.mrb[2].mxu0  ;;  %v525_v21 = vpop.f32.mrb[2].mxu1  ;;  %v341_v22 = vmul.f32 %v176_v18, %v176_v18  ;;  %v349_v61 = vmul.f32 %v208_v19, %v208_v19 }
  0xf8   :  { %v443_v23 = vpack.c.bf16 %v517_v20, %v516_v16  ;;  %v179_v24 = vpop.f32.mrb[3].mxu0  ;;  %v463_v25 = vpack.c.bf16 %v525_v21, %v524_v17  ;;  %v211_v26 = vpop.f32.mrb[3].mxu1  ;;  %v344_v34 = vmul.f32 %v517_v20, %v517_v20  ;;  %v352_v6 = vmul.f32 %v525_v21, %v525_v21 }
  0xf9   :  { %v438_v27 = vpack.c.bf16 %v179_v24, %v176_v18  ;;  %v319_v28 = vadd.f32 %v179_v24, %v176_v18  ;;  %v342_v29 = vmul.f32 %v179_v24, %v179_v24  ;;  %v458_v30 = vpack.c.bf16 %v211_v26, %v208_v19 }
  0xfa   :  { %475 = vst [vmem:[%s662_s2 + $0x8] sm:$0xff] %v443_v23   ;;  %479 = vst [vmem:[%s662_s2 + $0x28] sm:$0xff] %v463_v25   ;;  %v350_v2 = vmul.f32 %v211_v26, %v211_v26 }
  0xfb   :  { %439 = vst [vmem:[%s662_s2] sm:$0xff] %v438_v27   ;;  %v320_v32 = vadd.f32 %v516_v16, %v319_v28  ;;  %v357_v33 = vadd.f32 %v342_v29, %v341_v22  ;;  %478 = vst [vmem:[%s662_s2 + $0x20] sm:$0xff] %v458_v30  }
  0xfd   :  { %v358_v35 = vadd.f32 %v357_v33, %v343_v31  ;;  %v520_v36 = vpop.f32.mrb[4].mxu0  ;;  %v321_v37 = vadd.f32 %v517_v20, %v320_v32  ;;  %v528_v38 = vpop.f32.mrb[4].mxu1 }
  0xfe   :  { %v192_v39 = vpop.f32.mrb[5].mxu0  ;;  %v224_v40 = vpop.f32.mrb[5].mxu1  ;;  %v347_v55 = vmul.f32 %v520_v36, %v520_v36  ;;  %v355_v15 = vmul.f32 %v528_v38, %v528_v38 }
  0xff   :  { %v322_v41 = vadd.f32 %v321_v37, %v192_v39  ;;  %v345_v42 = vmul.f32 %v192_v39, %v192_v39  ;;  %v359_v43 = vadd.f32 %v358_v35, %v344_v34  ;;  %v521_v44 = vpop.f32.mrb[6].mxu0  ;;  %v529_v45 = vpop.f32.mrb[6].mxu1  ;;  %v353_v9 = vmul.f32 %v224_v40, %v224_v40 }
 0x100   :  { %v453_v46 = vpack.c.bf16 %v521_v44, %v520_v36  ;;  %v195_v47 = vpop.f32.mrb[7].mxu0  ;;  %v473_v48 = vpack.c.bf16 %v529_v45, %v528_v38  ;;  %v227_v49 = vpop.f32.mrb[7].mxu1  ;;  %v348_v58 = vmul.f32 %v521_v44, %v521_v44 }
 0x101   :  { %v360_v50 = vadd.f32 %v359_v43, %v345_v42  ;;  %v448_v51 = vpack.c.bf16 %v195_v47, %v192_v39  ;;  %v323_v52 = vadd.f32 %v322_v41, %v195_v47  ;;  %v346_v53 = vmul.f32 %v195_v47, %v195_v47 }
 0x102   :  { %477 = vst [vmem:[%s662_s2 + $0x18] sm:$0xff] %v453_v46   ;;  %481 = vst [vmem:[%s662_s2 + $0x38] sm:$0xff] %v473_v48   ;;  %v468_v54 = vpack.c.bf16 %v227_v49, %v224_v40  ;;  %v354_v14 = vmul.f32 %v227_v49, %v227_v49 }
 0x103   :  { %476 = vst [vmem:[%s662_s2 + $0x10] sm:$0xff] %v448_v51   ;;  %v324_v56 = vadd.f32 %v520_v36, %v323_v52  ;;  %v361_v57 = vadd.f32 %v360_v50, %v346_v53 }
 0x104   :  { %480 = vst [vmem:[%s662_s2 + $0x30] sm:$0xff] %v468_v54  }
 0x105   :  { %v362_v59 = vadd.f32 %v361_v57, %v347_v55  ;;  %v325_v60 = vadd.f32 %v521_v44, %v324_v56 }
 0x107   :  { %v326_v62 = vadd.f32 %v325_v60, %v208_v19  ;;  %v363_v63 = vadd.f32 %v362_v59, %v348_v58  ;;  %v356_v19 = vmul.f32 %v529_v45, %v529_v45 }
 0x109   :  { %v364_v0 = vadd.f32 %v363_v63, %v349_v61  ;;  %v327_v1 = vadd.f32 %v326_v62, %v211_v26 }
 0x10b   :  { %v328_v4 = vadd.f32 %v524_v17, %v327_v1  ;;  %v365_v5 = vadd.f32 %v364_v0, %v350_v2 }
 0x10d   :  { %v366_v7 = vadd.f32 %v365_v5, %v351_v3  ;;  %v329_v8 = vadd.f32 %v525_v21, %v328_v4 }
 0x10f   :  { %v330_v10 = vadd.f32 %v329_v8, %v224_v40  ;;  %v367_v11 = vadd.f32 %v366_v7, %v352_v6 }
 0x111   :  { %v368_v12 = vadd.f32 %v367_v11, %v353_v9  ;;  %v331_v13 = vadd.f32 %v330_v10, %v227_v49 }
 0x113   :  { %v332_v16 = vadd.f32 %v528_v38, %v331_v13  ;;  %v369_v18 = vadd.f32 %v368_v12, %v354_v14 }
 0x115   :  { %v333_v20 = vadd.f32 %v529_v45, %v332_v16  ;;  %v370_v22 = vadd.f32 %v369_v18, %v355_v15 }
 0x117   :  { %v334_v23 = vrot.slane %v333_v20, 4  ;;  %v371_v24 = vadd.f32 %v370_v22, %v356_v19 }
 0x119   :  { %v335_v25 = vadd.f32 %v334_v23, %v333_v20  ;;  %v372_v17 = vrot.slane %v371_v24, 4 }
 0x11b   :  { %v336_v26 = vrot.slane %v335_v25, 2  ;;  %v373_v27 = vadd.f32 %v372_v17, %v371_v24 }
 0x11d   :  { %v337_v28 = vadd.f32 %v336_v26, %v335_v25  ;;  %v374_v21 = vrot.slane %v373_v27, 2 }
 0x11f   :  { %v338_v29 = vrot.slane %v337_v28, 1  ;;  %v375_v30 = vadd.f32 %v374_v21, %v373_v27 }
 0x121   :  { %v339_v31 = vadd.f32 %v338_v29, %v337_v28  ;;  %v376_v32 = vrot.slane %v375_v30, 1 }
 0x123   :  { %340 = vst [vmem:[%s663_s3] sm:$0x1] %v339_v31  ;;  %v377_v33 = vadd.f32 %v376_v32, %v375_v30 }
 0x125   :  { %378 = vst [vmem:[%s663_s3 + $0x1] sm:$0x1] %v377_v33 }

// kernel: basic_block_forward.7
= control target key start
LH: loop header
LB: loop body
LE: loop exit
PB: predicated region body
PF: predicated region fallthrough
CT: control target
= control target key end

     0   :  { %s650_s0 = inlined_call_operand.vmem [shape: bf16[128,128], index: 0, kind: input, shape index: {}]   ;;  %s651_s1 = inlined_call_operand.vmem [shape: f32[2,128], index: 1, kind: input, shape index: {}]   ;;  %s652_s2 = inlined_call_operand.vmem [shape: bf16[128,256], index: 2, kind: input, shape index: {}]   ;;  %s653_s3 = inlined_call_operand.vmem [shape: f32[2,128], index: 3, kind: input, shape index: {}]   ;;  %s654_s4 = inlined_call_operand.vmem [shape: f32[128,128], index: 4, kind: output, shape index: {}]  }
   0x1   :  { %v323_v0 = vld [vmem:[%s652_s2 + $0x4] sm:$0xf]  ;;  %v324_v1 = vld [vmem:[%s652_s2 + $0xc] sm:$0xf]  ;;  %v325_v2 = vld [vmem:[%s652_s2 + $0x14] sm:$0xf] }
   0x2   :  { %32 = vst [vmem:[#allocation2] sm:$0xf] %v323_v0  ;;  %34 = vst [vmem:[#allocation2 + $0x4] sm:$0xf] %v324_v1  ;;  %v326_v3 = vld [vmem:[%s652_s2 + $0x1c] sm:$0xf] }
   0x3   :  { %36 = vst [vmem:[#allocation2 + $0x8] sm:$0xf] %v325_v2  ;;  %v327_v4 = vld [vmem:[%s652_s2 + $0x24] sm:$0xf]  ;;  %v328_v5 = vld [vmem:[%s652_s2 + $0x2c] sm:$0xf] }
   0x4   :  { %38 = vst [vmem:[#allocation2 + $0xc] sm:$0xf] %v326_v3  ;;  %40 = vst [vmem:[#allocation2 + $0x10] sm:$0xf] %v327_v4  ;;  %v329_v6 = vld [vmem:[%s652_s2 + $0x34] sm:$0xf] }
   0x5   :  { %42 = vst [vmem:[#allocation2 + $0x14] sm:$0xf] %v328_v5  ;;  %v330_v7 = vld [vmem:[%s652_s2 + $0x3c] sm:$0xf]  ;;  %v331_v8 = vld [vmem:[%s652_s2 + $0x44] sm:$0xf] }
   0x6   :  { %44 = vst [vmem:[#allocation2 + $0x18] sm:$0xf] %v329_v6  ;;  %46 = vst [vmem:[#allocation2 + $0x1c] sm:$0xf] %v330_v7  ;;  %v332_v9 = vld [vmem:[%s652_s2 + $0x4c] sm:$0xf] }
   0x7   :  { %48 = vst [vmem:[#allocation2 + $0x20] sm:$0xf] %v331_v8  ;;  %v333_v10 = vld [vmem:[%s652_s2 + $0x54] sm:$0xf]  ;;  %v334_v11 = vld [vmem:[%s652_s2 + $0x5c] sm:$0xf] }
   0x8   :  { %50 = vst [vmem:[#allocation2 + $0x24] sm:$0xf] %v332_v9  ;;  %52 = vst [vmem:[#allocation2 + $0x28] sm:$0xf] %v333_v10  ;;  %v335_v12 = vld [vmem:[%s652_s2 + $0x64] sm:$0xf] }
   0x9   :  { %54 = vst [vmem:[#allocation2 + $0x2c] sm:$0xf] %v334_v11  ;;  %v336_v13 = vld [vmem:[%s652_s2 + $0x6c] sm:$0xf]  ;;  %v337_v14 = vld [vmem:[%s652_s2 + $0x74] sm:$0xf] }
   0xa   :  { %56 = vst [vmem:[#allocation2 + $0x30] sm:$0xf] %v335_v12  ;;  %58 = vst [vmem:[#allocation2 + $0x34] sm:$0xf] %v336_v13  ;;  %v338_v15 = vld [vmem:[%s652_s2 + $0x7c] sm:$0xf] }
   0xb   :  { %60 = vst [vmem:[#allocation2 + $0x38] sm:$0xf] %v337_v14  ;;  %v344_v16 = vld [vmem:[%s650_s0] sm:$0xff]   ;;  %62 = vst [vmem:[#allocation2 + $0x3c] sm:$0xf] %v338_v15  ;;  %v407_v21 = vld [vmem:[%s650_s0 + $0x8] sm:$0xff]  }
   0xc   :  { %v500_v17 = vld [vmem:[%s651_s1] ss:$0 sm:$0xff]  ;;  %v345_v18 = vunpack.c.l.bf16 %v344_v16  ;;  %v346_v19 = vunpack.c.h.bf16 %v344_v16  ;;  %v505_v20 = vld [vmem:[%s651_s1 + $0x1] ss:$0 sm:$0xff]  ;;  %v408_v22 = vld [vmem:[%s650_s0 + $0x10] sm:$0xff]   ;;  %v349_v27 = vunpack.c.l.bf16 %v407_v21  ;;  %v350_v28 = vunpack.c.h.bf16 %v407_v21 }
   0xd   :  { %v376_v24 = vld [vmem:[#allocation2] sm:$0xff]   ;;  %v414_v31 = vld [vmem:[#allocation2 + $0x8] sm:$0xff]   ;;  %v353_v32 = vunpack.c.l.bf16 %v408_v22  ;;  %v415_v33 = vld [vmem:[#allocation2 + $0x10] sm:$0xff]   ;;  %v354_v34 = vunpack.c.h.bf16 %v408_v22 }
   0xe   :  { %v156_v23 = vmul.f32 %v345_v18, %v500_v17  ;;  %v517_v25 = vld [vmem:[%s653_s3] ss:$0 sm:$0xff]  ;;  %v157_v26 = vmul.f32 %v346_v19, %v500_v17  ;;  %v377_v29 = vunpack.c.l.bf16 %v376_v24  ;;  %v378_v30 = vunpack.c.h.bf16 %v376_v24  ;;  %v524_v36 = vld [vmem:[%s653_s3 + $0x1] ss:$0 sm:$0xff]  ;;  %v409_v52 = vld [vmem:[%s650_s0 + $0x18] sm:$0xff]  }
   0xf   :  { %v158_v38 = vmul.f32 %v349_v27, %v500_v17  ;;  %v381_v39 = vunpack.c.l.bf16 %v414_v31  ;;  %v159_v42 = vmul.f32 %v350_v28, %v500_v17  ;;  %v382_v43 = vunpack.c.h.bf16 %v414_v31  ;;  %v416_v61 = vld [vmem:[#allocation2 + $0x18] sm:$0xff]   ;;  %v410_v6 = vld [vmem:[%s650_s0 + $0x20] sm:$0xff]   ;;  %v411_v31 = vld [vmem:[%s650_s0 + $0x28] sm:$0xff]  }
  0x10   :  { %v177_v35 = vadd.f32 %v505_v20, %v156_v23  ;;  %v178_v37 = vadd.f32 %v505_v20, %v157_v26  ;;  %v230_v40 = vmul.f32 %v377_v29, %v517_v25  ;;  %v231_v41 = vmul.f32 %v378_v30, %v517_v25  ;;  %v417_v11 = vld [vmem:[#allocation2 + $0x20] sm:$0xff]  }
  0x11   :  { %v179_v44 = vadd.f32 %v505_v20, %v158_v38  ;;  %v232_v45 = vmul.f32 %v381_v39, %v517_v25  ;;  %v160_v46 = vmul.f32 %v353_v32, %v500_v17  ;;  %v385_v47 = vunpack.c.l.bf16 %v415_v33  ;;  %v418_v32 = vld [vmem:[#allocation2 + $0x28] sm:$0xff]  }
  0x12   :  { %v251_v48 = vadd.f32 %v524_v36, %v230_v40  ;;  %v252_v49 = vadd.f32 %v524_v36, %v231_v41  ;;  %v180_v50 = vadd.f32 %v505_v20, %v159_v42  ;;  %v233_v51 = vmul.f32 %v382_v43, %v517_v25 }
  0x13   :  { %v253_v53 = vadd.f32 %v524_v36, %v232_v45  ;;  %v181_v54 = vadd.f32 %v505_v20, %v160_v46  ;;  %v234_v55 = vmul.f32 %v385_v47, %v517_v25  ;;  %v161_v56 = vmul.f32 %v354_v34, %v500_v17  ;;  %v412_v46 = vld [vmem:[%s650_s0 + $0x30] sm:$0xff]  }
  0x14   :  { %v267_v57 = vadd.f32 %v251_v48, %v177_v35  ;;  %v268_v58 = vadd.f32 %v252_v49, %v178_v37  ;;  %v254_v59 = vadd.f32 %v524_v36, %v233_v51  ;;  %v386_v60 = vunpack.c.h.bf16 %v415_v33  ;;  %v419_v51 = vld [vmem:[#allocation2 + $0x30] sm:$0xff]  }
  0x15   :  { %v269_v62 = vadd.f32 %v253_v53, %v179_v44  ;;  %v255_v63 = vadd.f32 %v524_v36, %v234_v55  ;;  %v182_v0 = vadd.f32 %v505_v20, %v161_v56  ;;  %v357_v1 = vunpack.c.l.bf16 %v409_v52 }
  0x16   :  { %v283_v2 = vmax.f32 %v267_v57, 0.0  ;;  %v284_v3 = vmax.f32 %v268_v58, 0.0  ;;  %v270_v4 = vadd.f32 %v254_v59, %v180_v50  ;;  %v235_v5 = vmul.f32 %v386_v60, %v517_v25 }
  0x17   :  { %v285_v7 = vmax.f32 %v269_v62, 0.0  ;;  %v271_v8 = vadd.f32 %v255_v63, %v181_v54  ;;  %v162_v9 = vmul.f32 %v357_v1, %v500_v17  ;;  %v389_v10 = vunpack.c.l.bf16 %v416_v61  ;;  %v420_v1 = vld [vmem:[#allocation2 + $0x38] sm:$0xff]  }
  0x18   :  { %299 = vst [vmem:[%s654_s4] sm:$0xff] %v283_v2  ;;  %300 = vst [vmem:[%s654_s4 + $0x8] sm:$0xff] %v284_v3  ;;  %v286_v12 = vmax.f32 %v270_v4, 0.0  ;;  %v256_v13 = vadd.f32 %v524_v36, %v235_v5  ;;  %v358_v14 = vunpack.c.h.bf16 %v409_v52  ;;  %v390_v15 = vunpack.c.h.bf16 %v416_v61 }
  0x19   :  { %301 = vst [vmem:[%s654_s4 + $0x10] sm:$0xff] %v285_v7  ;;  %v287_v16 = vmax.f32 %v271_v8, 0.0  ;;  %v183_v18 = vadd.f32 %v505_v20, %v162_v9  ;;  %v236_v19 = vmul.f32 %v389_v10, %v517_v25  ;;  %v361_v21 = vunpack.c.l.bf16 %v410_v6 }
  0x1a   :  { %302 = vst [vmem:[%s654_s4 + $0x18] sm:$0xff] %v286_v12  ;;  %v272_v22 = vadd.f32 %v256_v13, %v182_v0  ;;  %v163_v23 = vmul.f32 %v358_v14, %v500_v17  ;;  %v237_v24 = vmul.f32 %v390_v15, %v517_v25  ;;  %v393_v26 = vunpack.c.l.bf16 %v417_v11  ;;  %v413_v0 = vld [vmem:[%s650_s0 + $0x38] sm:$0xff]  }
  0x1b   :  { %303 = vst [vmem:[%s654_s4 + $0x20] sm:$0xff] %v287_v16  ;;  %v257_v27 = vadd.f32 %v524_v36, %v236_v19  ;;  %v164_v28 = vmul.f32 %v361_v21, %v500_v17  ;;  %v362_v29 = vunpack.c.h.bf16 %v410_v6  ;;  %v394_v30 = vunpack.c.h.bf16 %v417_v11 }
  0x1c   :  { %v288_v33 = vmax.f32 %v272_v22, 0.0  ;;  %v184_v34 = vadd.f32 %v505_v20, %v163_v23  ;;  %v258_v35 = vadd.f32 %v524_v36, %v237_v24  ;;  %v238_v37 = vmul.f32 %v393_v26, %v517_v25 }
  0x1d   :  { %v273_v38 = vadd.f32 %v257_v27, %v183_v18  ;;  %v185_v39 = vadd.f32 %v505_v20, %v164_v28  ;;  %v165_v40 = vmul.f32 %v362_v29, %v500_v17  ;;  %v239_v41 = vmul.f32 %v394_v30, %v517_v25 }
  0x1e   :  { %304 = vst [vmem:[%s654_s4 + $0x28] sm:$0xff] %v288_v33  ;;  %v274_v42 = vadd.f32 %v258_v35, %v184_v34  ;;  %v259_v43 = vadd.f32 %v524_v36, %v238_v37  ;;  %v365_v44 = vunpack.c.l.bf16 %v411_v31  ;;  %v397_v45 = vunpack.c.l.bf16 %v418_v32 }
  0x1f   :  { %v289_v47 = vmax.f32 %v273_v38, 0.0  ;;  %v186_v48 = vadd.f32 %v505_v20, %v165_v40  ;;  %v260_v49 = vadd.f32 %v524_v36, %v239_v41  ;;  %v366_v50 = vunpack.c.h.bf16 %v411_v31 }
  0x20   :  { %v290_v52 = vmax.f32 %v274_v42, 0.0  ;;  %v275_v53 = vadd.f32 %v259_v43, %v185_v39  ;;  %v166_v54 = vmul.f32 %v365_v44, %v500_v17  ;;  %v240_v55 = vmul.f32 %v397_v45, %v517_v25 }
  0x21   :  { %305 = vst [vmem:[%s654_s4 + $0x30] sm:$0xff] %v289_v47  ;;  %v276_v56 = vadd.f32 %v260_v49, %v186_v48  ;;  %v167_v57 = vmul.f32 %v366_v50, %v500_v17  ;;  %v398_v58 = vunpack.c.h.bf16 %v418_v32  ;;  %v369_v59 = vunpack.c.l.bf16 %v412_v46 }
  0x22   :  { %306 = vst [vmem:[%s654_s4 + $0x38] sm:$0xff] %v290_v52  ;;  %v291_v60 = vmax.f32 %v275_v53, 0.0  ;;  %v187_v61 = vadd.f32 %v505_v20, %v166_v54  ;;  %v261_v62 = vadd.f32 %v524_v36, %v240_v55  ;;  %v401_v63 = vunpack.c.l.bf16 %v419_v51 }
  0x23   :  { %v292_v2 = vmax.f32 %v276_v56, 0.0  ;;  %v188_v3 = vadd.f32 %v505_v20, %v167_v57  ;;  %v241_v4 = vmul.f32 %v398_v58, %v517_v25  ;;  %v168_v5 = vmul.f32 %v369_v59, %v500_v17 }
  0x24   :  { %307 = vst [vmem:[%s654_s4 + $0x40] sm:$0xff] %v291_v60  ;;  %v277_v6 = vadd.f32 %v261_v62, %v187_v61  ;;  %v242_v7 = vmul.f32 %v401_v63, %v517_v25  ;;  %v370_v8 = vunpack.c.h.bf16 %v412_v46  ;;  %v402_v9 = vunpack.c.h.bf16 %v419_v51 }
  0x25   :  { %308 = vst [vmem:[%s654_s4 + $0x48] sm:$0xff] %v292_v2  ;;  %v262_v10 = vadd.f32 %v524_v36, %v241_v4  ;;  %v189_v11 = vadd.f32 %v505_v20, %v168_v5  ;;  %v373_v12 = vunpack.c.l.bf16 %v413_v0  ;;  %v405_v13 = vunpack.c.l.bf16 %v420_v1 }
  0x26   :  { %v293_v14 = vmax.f32 %v277_v6, 0.0  ;;  %v263_v15 = vadd.f32 %v524_v36, %v242_v7  ;;  %v169_v16 = vmul.f32 %v370_v8, %v500_v17  ;;  %v243_v18 = vmul.f32 %v402_v9, %v517_v25 }
  0x27   :  { %v278_v19 = vadd.f32 %v262_v10, %v188_v3  ;;  %v170_v21 = vmul.f32 %v373_v12, %v500_v17  ;;  %v244_v22 = vmul.f32 %v405_v13, %v517_v25  ;;  %v374_v23 = vunpack.c.h.bf16 %v413_v0 }
  0x28   :  { %309 = vst [vmem:[%s654_s4 + $0x50] sm:$0xff] %v293_v14  ;;  %v279_v24 = vadd.f32 %v263_v15, %v189_v11  ;;  %v190_v26 = vadd.f32 %v505_v20, %v169_v16  ;;  %v264_v27 = vadd.f32 %v524_v36, %v243_v18  ;;  %v406_v28 = vunpack.c.h.bf16 %v420_v1 }
  0x29   :  { %v294_v29 = vmax.f32 %v278_v19, 0.0  ;;  %v191_v30 = vadd.f32 %v505_v20, %v170_v21  ;;  %v265_v31 = vadd.f32 %v524_v36, %v244_v22  ;;  %v171_v32 = vmul.f32 %v374_v23, %v500_v17 }
  0x2a   :  { %v295_v33 = vmax.f32 %v279_v24, 0.0  ;;  %v280_v34 = vadd.f32 %v264_v27, %v190_v26  ;;  %v245_v35 = vmul.f32 %v406_v28, %v517_v25 }
  0x2b   :  { %310 = vst [vmem:[%s654_s4 + $0x58] sm:$0xff] %v294_v29  ;;  %v281_v37 = vadd.f32 %v265_v31, %v191_v30  ;;  %v192_v38 = vadd.f32 %v505_v20, %v171_v32 }
  0x2c   :  { %311 = vst [vmem:[%s654_s4 + $0x60] sm:$0xff] %v295_v33  ;;  %v296_v39 = vmax.f32 %v280_v34, 0.0  ;;  %v266_v40 = vadd.f32 %v524_v36, %v245_v35 }
  0x2d   :  { %v297_v41 = vmax.f32 %v281_v37, 0.0 }
  0x2e   :  { %312 = vst [vmem:[%s654_s4 + $0x68] sm:$0xff] %v296_v39  ;;  %v282_v17 = vadd.f32 %v266_v40, %v192_v38 }
  0x2f   :  { %313 = vst [vmem:[%s654_s4 + $0x70] sm:$0xff] %v297_v41 }
  0x30   :  { %v298_v25 = vmax.f32 %v282_v17, 0.0 }
  0x32   :  { %314 = vst [vmem:[%s654_s4 + $0x78] sm:$0xff] %v298_v25 }

</bundles_post_ra>
